<compile_context>
chip_gen: v7x
topology: tpu7x:2x2x1
jax: 0.10.0
libtpu: 0.0.40
codegen_flags: <defaults>
</compile_context>

<pallas_src>
import functools
import numpy as np
import jax
import jax.numpy as jnp
from jax.experimental import pallas as pl
from jax.experimental.pallas import tpu as pltpu

LN_EPS = 1e-5
MASK_BIAS = -1e9


def _layer_norm(v, w, b):
    mu = jnp.mean(v, axis=-1, keepdims=True)
    var = jnp.mean(jnp.square(v - mu), axis=-1, keepdims=True)
    return (v - mu) * jax.lax.rsqrt(var + LN_EPS) * w + b


def _quick_gelu(x):
    # CLIP uses QuickGELU inside its resblocks.
    return x * jax.nn.sigmoid(1.702 * x)


def _causal_bias(L):
    row = jnp.arange(L)[:, None]
    col = jnp.arange(L)[None, :]
    return jnp.where(col <= row, 0.0, MASK_BIAS).astype(jnp.float32)


def _text_encoder_kernel(prompt_ref, pos_ref, mask_ref,
                         ln1_w_ref, ln1_b_ref,
                         wqkv_ref, bqkv_ref, wo_ref, bo_ref,
                         ln2_w_ref, ln2_b_ref,
                         w1_ref, b1_ref, w2_ref, b2_ref,
                         lnf_w_ref, lnf_b_ref,
                         out_ref, x_carry, attn_stage, *, num_heads):
    layer = pl.program_id(1)

    @pl.when(layer == 0)
    def _():
        # x = prompt + positional_embedding (per batch tile, f32 residual stream)
        x_carry[...] = (prompt_ref[...].astype(jnp.float32)
                        + pos_ref[...].astype(jnp.float32)[None, :, :])

    x = x_carry[...]                      # (Bt, Lp, D) f32 residual stream
    Bt, Lp, D = x.shape
    H = num_heads
    hd = D // H
    f32 = jnp.float32
    bf16 = jnp.bfloat16
    rows = Bt * Lp

    # ---- residual attention block: x = x + attn(ln_1(x)) ----
    h = _layer_norm(x, ln1_w_ref[...], ln1_b_ref[...])
    h2d = h.reshape(rows, D).astype(bf16)               # free relayout (Lp % 8 == 0)
    qkv = jnp.dot(h2d, wqkv_ref[...], preferred_element_type=f32) + bqkv_ref[...]
    qkv3 = qkv.reshape(Bt, Lp, 3 * D)
    # 1/sqrt(head_dim) is pre-folded into wqkv/bqkv Q columns (see init_params).
    q = qkv3[..., 0 * D:1 * D].astype(bf16)
    k = qkv3[..., 1 * D:2 * D].astype(bf16)
    v = qkv3[..., 2 * D:3 * D].astype(bf16)
    # Hoist the mask broadcast out of the head loop (no CSE of broadcast_in_dim).
    bias = jnp.broadcast_to(mask_ref[...][None, :, :], (Bt, Lp, Lp))

    # Small static head loop; multi-batch-dim dot_general / 4-D transposes are
    # not reliably lowered by Mosaic.  Each head writes its PV result directly
    # into the bf16 staging buffer feeding the output projection.
    for hh in range(H):
        sl = slice(hh * hd, (hh + 1) * hd)
        s = jnp.einsum('bld,bmd->blm', q[..., sl], k[..., sl],
                       preferred_element_type=f32) + bias
        m = jnp.max(s, axis=-1, keepdims=True)
        p = jnp.exp(s - m)
        denom = jnp.sum(p, axis=-1, keepdims=True)
        p = p * pl.reciprocal(denom, approx=True)        # EUP reciprocal
        pv = jnp.einsum('blm,bmd->bld', p.astype(bf16), v[..., sl],
                        preferred_element_type=f32)
        attn_stage[:, sl] = pv.reshape(rows, hd).astype(bf16)

    proj = jnp.dot(attn_stage[...], wo_ref[...], preferred_element_type=f32) + bo_ref[...]
    x = x + proj.reshape(Bt, Lp, D)

    # ---- x = x + mlp(ln_2(x)) ----
    h2 = _layer_norm(x, ln2_w_ref[...], ln2_b_ref[...])
    u = jnp.dot(h2.reshape(rows, D).astype(bf16), w1_ref[...],
                preferred_element_type=f32) + b1_ref[...]
    u = _quick_gelu(u)
    mlp = jnp.dot(u.astype(bf16), w2_ref[...], preferred_element_type=f32) + b2_ref[...]
    x = x + mlp.reshape(Bt, Lp, D)

    x_carry[...] = x

    # forward() stacks every layer's output and applies ln_final (shared params)
    # to the stack; apply per layer here and write out[layer] in bf16.
    out_ref[...] = _layer_norm(x, lnf_w_ref[...], lnf_b_ref[...]).astype(out_ref.dtype)


def _vmem_capacity_bytes():
    try:
        return int(pltpu.get_tpu_info().vmem_capacity_bytes)
    except Exception:
        return 64 << 20                    # conservative (v7x per-TC VMEM)


def _vmem_need_bytes(b_tile, Lp, D):
    rows = b_tile * Lp
    w_layer = 12 * D * D * 2                               # bf16 per-layer matrices
    b_layer = (3 * D + D + 4 * D + D + 4 * D) * 4          # f32 biases + LN params
    weights = 2 * (w_layer + b_layer)                      # double-buffered
    io = 2 * (b_tile * Lp * D * 4) + 2 * (b_tile * Lp * D * 2)   # prompt in / bf16 out blocks
    const = 2 * (Lp * D * 4 + Lp * Lp * 4 + 2 * D * 4)     # pos, mask, ln_final
    scratch = b_tile * Lp * D * 4 + rows * D * 2           # x_carry f32 + attn staging bf16
    work = (rows * (3 * D + 4 * D + 4 * D) * 4             # qkv + fc1 (f32 + bf16 copies)
            + rows * D * 8 + b_tile * Lp * Lp * 12)        # misc temps + per-head scores
    return weights + io + const + scratch + work + (4 << 20)


def _choose_b_tile(B, Lp, D, budget):
    """Largest divisor of B fitting the VMEM budget, keeping >= 2 batch tiles
    so the 'parallel' axis can feed both TensorCores (megacore / v7x)."""
    best = 1
    for bt in range(1, B + 1):
        if B % bt:
            continue
        if B >= 2 and (B // bt) < 2:
            continue
        if _vmem_need_bytes(bt, Lp, D) <= budget:
            best = bt
    return best


def text_encoder_forward(prompt, params, *, num_heads=4, b_tile=None):
    B, L, D = prompt.shape
    layers = params['wqkv'].shape[0]
    assert D % num_heads == 0

    # Pad seq length to a multiple of 8 so all in-kernel reshapes are free.
    Lp = ((L + 7) // 8) * 8
    pad = Lp - L
    prompt_p = jnp.pad(prompt, ((0, 0), (0, pad), (0, 0))) if pad else prompt
    pos_p = jnp.pad(params['pos'], ((0, pad), (0, 0))) if pad else params['pos']
    # Causal mask already prevents real queries (i < L) from attending to pad
    # keys (j >= L > i); pad query rows are discarded after the call.
    mask = _causal_bias(Lp)

    capacity = _vmem_capacity_bytes()
    budget = int(0.8 * capacity)
    if b_tile is None:
        b_tile = _choose_b_tile(B, Lp, D, budget)
    assert B % b_tile == 0
    need = _vmem_need_bytes(b_tile, Lp, D)
    vmem_limit = int(min(max(int(need * 1.25), 32 << 20), int(0.9 * capacity)))

    def wmap(b, i):                       # per-layer parameter blocks
        return (i, 0, 0)

    in_specs = [
        pl.BlockSpec((b_tile, Lp, D), lambda b, i: (b, 0, 0)),    # prompt
        pl.BlockSpec((Lp, D), lambda b, i: (0, 0)),               # positional_embedding
        pl.BlockSpec((Lp, Lp), lambda b, i: (0, 0)),              # causal additive mask
        pl.BlockSpec((None, 1, D), wmap),                         # ln1_w
        pl.BlockSpec((None, 1, D), wmap),                         # ln1_b
        pl.BlockSpec((None, D, 3 * D), wmap),                     # wqkv (bf16, scale folded)
        pl.BlockSpec((None, 1, 3 * D), wmap),                     # bqkv
        pl.BlockSpec((None, D, D), wmap),                         # wo (bf16)
        pl.BlockSpec((None, 1, D), wmap),                         # bo
        pl.BlockSpec((None, 1, D), wmap),                         # ln2_w
        pl.BlockSpec((None, 1, D), wmap),                         # ln2_b
        pl.BlockSpec((None, D, 4 * D), wmap),                     # w1 (bf16)
        pl.BlockSpec((None, 1, 4 * D), wmap),                     # b1
        pl.BlockSpec((None, 4 * D, D), wmap),                     # w2 (bf16)
        pl.BlockSpec((None, 1, D), wmap),                         # b2
        pl.BlockSpec((1, D), lambda b, i: (0, 0)),                # ln_final weight
        pl.BlockSpec((1, D), lambda b, i: (0, 0)),                # ln_final bias
    ]
    out_spec = pl.BlockSpec((None, b_tile, Lp, D), lambda b, i: (i, b, 0, 0))

    # NOTE: layer axis must stay innermost + "arbitrary" (x_carry residual carry).
    out = pl.pallas_call(
        functools.partial(_text_encoder_kernel, num_heads=num_heads),
        out_shape=jax.ShapeDtypeStruct((layers, B, Lp, D), jnp.bfloat16),
        grid=(B // b_tile, layers),
        in_specs=in_specs,
        out_specs=out_spec,
        scratch_shapes=[pltpu.VMEM((b_tile, Lp, D), jnp.float32),       # residual carry
                        pltpu.VMEM((b_tile * Lp, D), jnp.bfloat16)],    # attn staging
        compiler_params=pltpu.CompilerParams(
            dimension_semantics=("parallel", "arbitrary"),
            vmem_limit_bytes=vmem_limit),
    )(prompt_p, pos_p, mask,
      params['ln1_w'], params['ln1_b'],
      params['wqkv'], params['bqkv'], params['wo'], params['bo'],
      params['ln2_w'], params['ln2_b'],
      params['w1'], params['b1'], params['w2'], params['b2'],
      params['lnf_w'], params['lnf_b'])

    if pad:
        out = out[:, :, :L, :]
    return out


def init_params(key, layers, L, D, num_heads=4):
    ks = jax.random.split(key, 16)
    s = float(D) ** -0.5
    f32, bf16 = jnp.float32, jnp.bfloat16
    hd = D // num_heads
    attn_scale = float(hd) ** -0.5
    p = {}
    p['pos'] = 0.01 * jax.random.normal(ks[0], (L, D), f32)
    p['ln1_w'] = jnp.ones((layers, 1, D), f32) + 0.01 * jax.random.normal(ks[1], (layers, 1, D), f32)
    p['ln1_b'] = 0.01 * jax.random.normal(ks[2], (layers, 1, D), f32)
    wqkv = s * jax.random.normal(ks[3], (layers, D, 3 * D), f32)
    bqkv = 0.01 * jax.random.normal(ks[4], (layers, 1, 3 * D), f32)
    # Fold the 1/sqrt(head_dim) attention scale into the Q columns (exact
    # mathematical rewrite of q @ k^T * scale; removes an in-kernel multiply).
    wqkv = wqkv.at[:, :, :D].multiply(attn_scale)
    bqkv = bqkv.at[:, :, :D].multiply(attn_scale)
    p['wqkv'] = wqkv.astype(bf16)
    p['bqkv'] = bqkv
    p['wo'] = (s * jax.random.normal(ks[5], (layers, D, D), f32)).astype(bf16)
    p['bo'] = 0.01 * jax.random.normal(ks[6], (layers, 1, D), f32)
    p['ln2_w'] = jnp.ones((layers, 1, D), f32) + 0.01 * jax.random.normal(ks[7], (layers, 1, D), f32)
    p['ln2_b'] = 0.01 * jax.random.normal(ks[8], (layers, 1, D), f32)
    p['w1'] = (s * jax.random.normal(ks[9], (layers, D, 4 * D), f32)).astype(bf16)
    p['b1'] = 0.01 * jax.random.normal(ks[10], (layers, 1, 4 * D), f32)
    p['w2'] = ((float(4 * D) ** -0.5) * jax.random.normal(ks[11], (layers, 4 * D, D), f32)).astype(bf16)
    p['b2'] = 0.01 * jax.random.normal(ks[12], (layers, 1, D), f32)
    p['lnf_w'] = jnp.ones((1, D), f32) + 0.01 * jax.random.normal(ks[13], (1, D), f32)
    p['lnf_b'] = 0.01 * jax.random.normal(ks[14], (1, D), f32)
    return p


def reference_forward(prompt, params, *, num_heads=4):
    # Pure-JAX mirror of the torch forward with identical bf16 matmul casts.
    # (Attention scale is already folded into wqkv/bqkv by init_params.)
    B, L, D = prompt.shape
    H = num_heads
    hd = D // H
    layers = params['wqkv'].shape[0]
    f32, bf16 = jnp.float32, jnp.bfloat16
    x = prompt.astype(f32) + params['pos'][None].astype(f32)
    bias = _causal_bias(L)[None]
    outs = []
    for i in range(layers):
        h = _layer_norm(x, params['ln1_w'][i], params['ln1_b'][i])
        qkv = jnp.dot(h.reshape(B * L, D).astype(bf16), params['wqkv'][i],
                      preferred_element_type=f32) + params['bqkv'][i]
        qkv = qkv.reshape(B, L, 3 * D)
        q = qkv[..., :D].astype(bf16)
        k = qkv[..., D:2 * D].astype(bf16)
        v = qkv[..., 2 * D:].astype(bf16)
        heads = []
        for hh in range(H):
            sl = slice(hh * hd, (hh + 1) * hd)
            s = jnp.einsum('bld,bmd->blm', q[..., sl], k[..., sl],
                           preferred_element_type=f32) + bias
            m = jnp.max(s, axis=-1, keepdims=True)
            pr = jnp.exp(s - m)
            pr = pr / jnp.sum(pr, axis=-1, keepdims=True)
            heads.append(jnp.einsum('blm,bmd->bld', pr.astype(bf16), v[..., sl],
                                    preferred_element_type=f32))
        attn = jnp.concatenate(heads, -1).reshape(B * L, D).astype(bf16)
        proj = jnp.dot(attn, params['wo'][i], preferred_element_type=f32) + params['bo'][i]
        x = x + proj.reshape(B, L, D)
        h2 = _layer_norm(x, params['ln2_w'][i], params['ln2_b'][i]).reshape(B * L, D).astype(bf16)
        u = _quick_gelu(jnp.dot(h2, params['w1'][i], preferred_element_type=f32) + params['b1'][i])
        mlp = jnp.dot(u.astype(bf16), params['w2'][i], preferred_element_type=f32) + params['b2'][i]
        x = x + mlp.reshape(B, L, D)
        outs.append(_layer_norm(x, params['lnf_w'], params['lnf_b']))
    return jnp.stack(outs)


if __name__ == "__main__":
    key = jax.random.PRNGKey(0)
    B, L, D, layers, H = 2, 8, 32, 3, 4     # small: batch=2, seq=8, width=32, 3 resblocks
    kp, kx = jax.random.split(key)
    params = init_params(kp, layers, L, D, num_heads=H)
    prompt = jax.random.normal(kx, (B, L, D), jnp.float32)

    out = text_encoder_forward(prompt, params, num_heads=H)
    out = jax.block_until_ready(out)
    assert out.shape == (layers, B, L, D), out.shape
    assert out.dtype == jnp.bfloat16, out.dtype

    ref = reference_forward(prompt, params, num_heads=H)
    np.testing.assert_allclose(np.asarray(out, dtype=np.float32), np.asarray(ref),
                               atol=3e-2, rtol=3e-2)
    print("KERNEL_OK")
</pallas_src>

<mosaic_0001>
module attributes {stable_mosaic.version = 11 : i64} {
  func.func @_text_encoder_kernel(%arg0: i32, %arg1: i32, %arg2: memref<1x8x32xf32, #tpu.memory_space<vmem>>, %arg3: memref<8x32xf32, #tpu.memory_space<vmem>>, %arg4: memref<8x8xf32, #tpu.memory_space<vmem>>, %arg5: memref<1x1x32xf32, #tpu.memory_space<vmem>>, %arg6: memref<1x1x32xf32, #tpu.memory_space<vmem>>, %arg7: memref<1x32x96xbf16, #tpu.memory_space<vmem>>, %arg8: memref<1x1x96xf32, #tpu.memory_space<vmem>>, %arg9: memref<1x32x32xbf16, #tpu.memory_space<vmem>>, %arg10: memref<1x1x32xf32, #tpu.memory_space<vmem>>, %arg11: memref<1x1x32xf32, #tpu.memory_space<vmem>>, %arg12: memref<1x1x32xf32, #tpu.memory_space<vmem>>, %arg13: memref<1x32x128xbf16, #tpu.memory_space<vmem>>, %arg14: memref<1x1x128xf32, #tpu.memory_space<vmem>>, %arg15: memref<1x128x32xbf16, #tpu.memory_space<vmem>>, %arg16: memref<1x1x32xf32, #tpu.memory_space<vmem>>, %arg17: memref<1x32xf32, #tpu.memory_space<vmem>>, %arg18: memref<1x32xf32, #tpu.memory_space<vmem>>, %arg19: memref<1x1x8x32xbf16, #tpu.memory_space<vmem>>, %arg20: memref<1x8x32xf32, #tpu.memory_space<vmem>>, %arg21: memref<8x32xbf16, #tpu.memory_space<vmem>>) attributes {dimension_semantics = [#tpu.dimension_semantics<parallel>, #tpu.dimension_semantics<arbitrary>], iteration_bounds = array<i64: 2, 3>, scalar_prefetch = 0 : i64, scratch_operands = 2 : i64, tpu.core_type = #tpu.core_type<tc>, window_params = [{transform_indices = @transform_0, window_bounds = array<i64: 1, 8, 32>}, {pipeline_mode = #tpu.pipeline_mode<synchronous>, transform_indices = @transform_1, window_bounds = array<i64: 8, 32>}, {pipeline_mode = #tpu.pipeline_mode<synchronous>, transform_indices = @transform_2, window_bounds = array<i64: 8, 8>}, {transform_indices = @transform_3, window_bounds = array<i64: 1, 1, 32>}, {transform_indices = @transform_4, window_bounds = array<i64: 1, 1, 32>}, {transform_indices = @transform_5, window_bounds = array<i64: 1, 32, 96>}, {transform_indices = @transform_6, window_bounds = array<i64: 1, 1, 96>}, {transform_indices = @transform_7, window_bounds = array<i64: 1, 32, 32>}, {transform_indices = @transform_8, window_bounds = array<i64: 1, 1, 32>}, {transform_indices = @transform_9, window_bounds = array<i64: 1, 1, 32>}, {transform_indices = @transform_10, window_bounds = array<i64: 1, 1, 32>}, {transform_indices = @transform_11, window_bounds = array<i64: 1, 32, 128>}, {transform_indices = @transform_12, window_bounds = array<i64: 1, 1, 128>}, {transform_indices = @transform_13, window_bounds = array<i64: 1, 128, 32>}, {transform_indices = @transform_14, window_bounds = array<i64: 1, 1, 32>}, {pipeline_mode = #tpu.pipeline_mode<synchronous>, transform_indices = @transform_15, window_bounds = array<i64: 1, 32>}, {pipeline_mode = #tpu.pipeline_mode<synchronous>, transform_indices = @transform_16, window_bounds = array<i64: 1, 32>}, {transform_indices = @transform_17, window_bounds = array<i64: 1, 1, 8, 32>}]} {
    %c0_i32 = arith.constant 0 : i32
    %0 = arith.cmpi eq, %arg1, %c0_i32 : i32
    %1 = arith.extui %0 : i1 to i32
    %c0_i32_0 = arith.constant 0 : i32
    %2 = arith.cmpi ne, %1, %c0_i32_0 : i32
    scf.if %2 {
      %c0_95 = arith.constant 0 : index
      %c0_96 = arith.constant 0 : index
      %c0_97 = arith.constant 0 : index
      %226 = vector.load %arg2[%c0_95, %c0_96, %c0_97] : memref<1x8x32xf32, #tpu.memory_space<vmem>>, vector<1x8x32xf32>
      %c0_98 = arith.constant 0 : index
      %c0_99 = arith.constant 0 : index
      %227 = vector.load %arg3[%c0_98, %c0_99] : memref<8x32xf32, #tpu.memory_space<vmem>>, vector<8x32xf32>
      %228 = vector.shape_cast %227 : vector<8x32xf32> to vector<1x8x32xf32>
      %229 = arith.addf %226, %228 : vector<1x8x32xf32>
      %c0_100 = arith.constant 0 : index
      %c0_101 = arith.constant 0 : index
      %c0_102 = arith.constant 0 : index
      %230 = vector.load %arg20[%c0_100, %c0_101, %c0_102] : memref<1x8x32xf32, #tpu.memory_space<vmem>>, vector<1x8x32xf32>
      tpu.vector_store %arg20[%c0_100, %c0_101, %c0_102], %229 {strides = array<i32>} : memref<1x8x32xf32, #tpu.memory_space<vmem>>, vector<1x8x32xf32>,
    } else {
    }
    %c0 = arith.constant 0 : index
    %c0_1 = arith.constant 0 : index
    %c0_2 = arith.constant 0 : index
    %3 = vector.load %arg20[%c0, %c0_1, %c0_2] : memref<1x8x32xf32, #tpu.memory_space<vmem>>, vector<1x8x32xf32>
    %c0_3 = arith.constant 0 : index
    %c0_4 = arith.constant 0 : index
    %c0_5 = arith.constant 0 : index
    %4 = vector.load %arg5[%c0_3, %c0_4, %c0_5] : memref<1x1x32xf32, #tpu.memory_space<vmem>>, vector<1x1x32xf32>
    %5 = vector.shape_cast %4 : vector<1x1x32xf32> to vector<1x32xf32>
    %c0_6 = arith.constant 0 : index
    %c0_7 = arith.constant 0 : index
    %c0_8 = arith.constant 0 : index
    %6 = vector.load %arg6[%c0_6, %c0_7, %c0_8] : memref<1x1x32xf32, #tpu.memory_space<vmem>>, vector<1x1x32xf32>
    %7 = vector.shape_cast %6 : vector<1x1x32xf32> to vector<1x32xf32>
    %cst = arith.constant dense<0.000000e+00> : vector<1x8xf32>
    %8 = vector.multi_reduction <add>, %3, %cst [2] : vector<1x8x32xf32> to vector<1x8xf32>
    %9 = vector.shape_cast %8 : vector<1x8xf32> to vector<1x8x1xf32>
    %cst_9 = arith.constant 3.200000e+01 : f32
    %10 = vector.broadcast %cst_9 : f32 to vector<1x8x1xf32>
    %11 = arith.divf %9, %10 : vector<1x8x1xf32>
    %12 = vector.broadcast %11 : vector<1x8x1xf32> to vector<1x8x32xf32>
    %13 = arith.subf %3, %12 : vector<1x8x32xf32>
    %14 = arith.mulf %13, %13 : vector<1x8x32xf32>
    %cst_10 = arith.constant dense<0.000000e+00> : vector<1x8xf32>
    %15 = vector.multi_reduction <add>, %14, %cst_10 [2] : vector<1x8x32xf32> to vector<1x8xf32>
    %16 = vector.shape_cast %15 : vector<1x8xf32> to vector<1x8x1xf32>
    %cst_11 = arith.constant 3.200000e+01 : f32
    %17 = vector.broadcast %cst_11 : f32 to vector<1x8x1xf32>
    %18 = arith.divf %16, %17 : vector<1x8x1xf32>
    %19 = vector.broadcast %11 : vector<1x8x1xf32> to vector<1x8x32xf32>
    %20 = arith.subf %3, %19 : vector<1x8x32xf32>
    %cst_12 = arith.constant 9.99999974E-6 : f32
    %21 = vector.broadcast %cst_12 : f32 to vector<1x8x1xf32>
    %22 = arith.addf %18, %21 : vector<1x8x1xf32>
    %23 = math.rsqrt %22 : vector<1x8x1xf32>
    %24 = vector.broadcast %23 : vector<1x8x1xf32> to vector<1x8x32xf32>
    %25 = arith.mulf %20, %24 : vector<1x8x32xf32>
    %26 = vector.shape_cast %5 : vector<1x32xf32> to vector<1x1x32xf32>
    %27 = vector.broadcast %26 : vector<1x1x32xf32> to vector<1x8x32xf32>
    %28 = arith.mulf %25, %27 : vector<1x8x32xf32>
    %29 = vector.shape_cast %7 : vector<1x32xf32> to vector<1x1x32xf32>
    %30 = vector.broadcast %29 : vector<1x1x32xf32> to vector<1x8x32xf32>
    %31 = arith.addf %28, %30 : vector<1x8x32xf32>
    %32 = vector.shape_cast %31 : vector<1x8x32xf32> to vector<8x32xf32>
    %33 = arith.truncf %32 : vector<8x32xf32> to vector<8x32xbf16>
    %c0_13 = arith.constant 0 : index
    %c0_14 = arith.constant 0 : index
    %c0_15 = arith.constant 0 : index
    %34 = vector.load %arg7[%c0_13, %c0_14, %c0_15] : memref<1x32x96xbf16, #tpu.memory_space<vmem>>, vector<1x32x96xbf16>
    %35 = vector.shape_cast %34 : vector<1x32x96xbf16> to vector<32x96xbf16>
    %cst_16 = arith.constant dense<0.000000e+00> : vector<8x96xf32>
    %36 = tpu.matmul %33, %35, %cst_16 {dimension_numbers = #tpu.dot_dimension_numbers<[1], [0], [0], [1], [0, 0, 1, 1], [], []>} : vector<8x32xbf16>, vector<32x96xbf16>, vector<8x96xf32> -> vector<8x96xf32>
    %c0_17 = arith.constant 0 : index
    %c0_18 = arith.constant 0 : index
    %c0_19 = arith.constant 0 : index
    %37 = vector.load %arg8[%c0_17, %c0_18, %c0_19] : memref<1x1x96xf32, #tpu.memory_space<vmem>>, vector<1x1x96xf32>
    %38 = vector.shape_cast %37 : vector<1x1x96xf32> to vector<1x96xf32>
    %39 = vector.broadcast %38 : vector<1x96xf32> to vector<8x96xf32>
    %40 = arith.addf %36, %39 : vector<8x96xf32>
    %41 = vector.shape_cast %40 : vector<8x96xf32> to vector<1x8x96xf32>
    %42 = vector.extract_strided_slice %41 {offsets = [0, 0, 0], sizes = [1, 8, 32], strides = [1, 1, 1]} : vector<1x8x96xf32> to vector<1x8x32xf32>
    %43 = arith.truncf %42 : vector<1x8x32xf32> to vector<1x8x32xbf16>
    %44 = vector.extract_strided_slice %41 {offsets = [0, 0, 32], sizes = [1, 8, 32], strides = [1, 1, 1]} : vector<1x8x96xf32> to vector<1x8x32xf32>
    %45 = arith.truncf %44 : vector<1x8x32xf32> to vector<1x8x32xbf16>
    %46 = vector.extract_strided_slice %41 {offsets = [0, 0, 64], sizes = [1, 8, 32], strides = [1, 1, 1]} : vector<1x8x96xf32> to vector<1x8x32xf32>
    %47 = arith.truncf %46 : vector<1x8x32xf32> to vector<1x8x32xbf16>
    %c0_20 = arith.constant 0 : index
    %c0_21 = arith.constant 0 : index
    %48 = vector.load %arg4[%c0_20, %c0_21] : memref<8x8xf32, #tpu.memory_space<vmem>>, vector<8x8xf32>
    %49 = vector.shape_cast %48 : vector<8x8xf32> to vector<1x8x8xf32>
    %50 = vector.extract_strided_slice %43 {offsets = [0, 0, 0], sizes = [1, 8, 8], strides = [1, 1, 1]} : vector<1x8x32xbf16> to vector<1x8x8xbf16>
    %51 = vector.extract_strided_slice %45 {offsets = [0, 0, 0], sizes = [1, 8, 8], strides = [1, 1, 1]} : vector<1x8x32xbf16> to vector<1x8x8xbf16>
    "tpu.trace_start"() <{level = 10 : i32, message = "bld,bmd->blm"}> : () -> ()
    %cst_22 = arith.constant dense<0.000000e+00> : vector<1x8x8xf32>
    %52 = tpu.matmul %50, %51, %cst_22 {dimension_numbers = #tpu.dot_dimension_numbers<[2], [2], [1], [1], [0, 0, 0, 1, 1, 1], [0], [0]>} : vector<1x8x8xbf16>, vector<1x8x8xbf16>, vector<1x8x8xf32> -> vector<1x8x8xf32>
    "tpu.trace_stop"() : () -> ()
    %53 = arith.addf %52, %49 : vector<1x8x8xf32>
    %cst_23 = arith.constant dense<0xFF800000> : vector<1x8xf32>
    %54 = vector.multi_reduction <maximumf>, %53, %cst_23 [2] : vector<1x8x8xf32> to vector<1x8xf32>
    %55 = vector.shape_cast %54 : vector<1x8xf32> to vector<1x8x1xf32>
    %56 = vector.broadcast %55 : vector<1x8x1xf32> to vector<1x8x8xf32>
    %57 = arith.subf %53, %56 : vector<1x8x8xf32>
    %58 = math.exp %57 : vector<1x8x8xf32>
    %cst_24 = arith.constant dense<0.000000e+00> : vector<1x8xf32>
    %59 = vector.multi_reduction <add>, %58, %cst_24 [2] : vector<1x8x8xf32> to vector<1x8xf32>
    %60 = vector.shape_cast %59 : vector<1x8xf32> to vector<1x8x1xf32>
    %61 = tpu.reciprocal %60 {approx = true} : vector<1x8x1xf32> -> vector<1x8x1xf32>
    %62 = vector.broadcast %61 : vector<1x8x1xf32> to vector<1x8x8xf32>
    %63 = arith.mulf %58, %62 : vector<1x8x8xf32>
    %64 = arith.truncf %63 : vector<1x8x8xf32> to vector<1x8x8xbf16>
    %65 = vector.extract_strided_slice %47 {offsets = [0, 0, 0], sizes = [1, 8, 8], strides = [1, 1, 1]} : vector<1x8x32xbf16> to vector<1x8x8xbf16>
    "tpu.trace_start"() <{level = 10 : i32, message = "blm,bmd->bld"}> : () -> ()
    %cst_25 = arith.constant dense<0.000000e+00> : vector<1x8x8xf32>
    %66 = tpu.matmul %64, %65, %cst_25 {dimension_numbers = #tpu.dot_dimension_numbers<[2], [1], [1], [2], [0, 0, 0, 1, 1, 2], [0], [0]>} : vector<1x8x8xbf16>, vector<1x8x8xbf16>, vector<1x8x8xf32> -> vector<1x8x8xf32>
    "tpu.trace_stop"() : () -> ()
    %67 = vector.shape_cast %66 : vector<1x8x8xf32> to vector<8x8xf32>
    %68 = arith.truncf %67 : vector<8x8xf32> to vector<8x8xbf16>
    %c0_26 = arith.constant 0 : index
    %c0_27 = arith.constant 0 : index
    %69 = vector.load %arg21[%c0_26, %c0_27] : memref<8x32xbf16, #tpu.memory_space<vmem>>, vector<8x8xbf16>
    tpu.vector_store %arg21[%c0_26, %c0_27], %68 {strides = array<i32>} : memref<8x32xbf16, #tpu.memory_space<vmem>>, vector<8x8xbf16>,
    %70 = vector.extract_strided_slice %43 {offsets = [0, 0, 8], sizes = [1, 8, 8], strides = [1, 1, 1]} : vector<1x8x32xbf16> to vector<1x8x8xbf16>
    %71 = vector.extract_strided_slice %45 {offsets = [0, 0, 8], sizes = [1, 8, 8], strides = [1, 1, 1]} : vector<1x8x32xbf16> to vector<1x8x8xbf16>
    "tpu.trace_start"() <{level = 10 : i32, message = "bld,bmd->blm"}> : () -> ()
    %cst_28 = arith.constant dense<0.000000e+00> : vector<1x8x8xf32>
    %72 = tpu.matmul %70, %71, %cst_28 {dimension_numbers = #tpu.dot_dimension_numbers<[2], [2], [1], [1], [0, 0, 0, 1, 1, 1], [0], [0]>} : vector<1x8x8xbf16>, vector<1x8x8xbf16>, vector<1x8x8xf32> -> vector<1x8x8xf32>
    "tpu.trace_stop"() : () -> ()
    %73 = arith.addf %72, %49 : vector<1x8x8xf32>
    %cst_29 = arith.constant dense<0xFF800000> : vector<1x8xf32>
    %74 = vector.multi_reduction <maximumf>, %73, %cst_29 [2] : vector<1x8x8xf32> to vector<1x8xf32>
    %75 = vector.shape_cast %74 : vector<1x8xf32> to vector<1x8x1xf32>
    %76 = vector.broadcast %75 : vector<1x8x1xf32> to vector<1x8x8xf32>
    %77 = arith.subf %73, %76 : vector<1x8x8xf32>
    %78 = math.exp %77 : vector<1x8x8xf32>
    %cst_30 = arith.constant dense<0.000000e+00> : vector<1x8xf32>
    %79 = vector.multi_reduction <add>, %78, %cst_30 [2] : vector<1x8x8xf32> to vector<1x8xf32>
    %80 = vector.shape_cast %79 : vector<1x8xf32> to vector<1x8x1xf32>
    %81 = tpu.reciprocal %80 {approx = true} : vector<1x8x1xf32> -> vector<1x8x1xf32>
    %82 = vector.broadcast %81 : vector<1x8x1xf32> to vector<1x8x8xf32>
    %83 = arith.mulf %78, %82 : vector<1x8x8xf32>
    %84 = arith.truncf %83 : vector<1x8x8xf32> to vector<1x8x8xbf16>
    %85 = vector.extract_strided_slice %47 {offsets = [0, 0, 8], sizes = [1, 8, 8], strides = [1, 1, 1]} : vector<1x8x32xbf16> to vector<1x8x8xbf16>
    "tpu.trace_start"() <{level = 10 : i32, message = "blm,bmd->bld"}> : () -> ()
    %cst_31 = arith.constant dense<0.000000e+00> : vector<1x8x8xf32>
    %86 = tpu.matmul %84, %85, %cst_31 {dimension_numbers = #tpu.dot_dimension_numbers<[2], [1], [1], [2], [0, 0, 0, 1, 1, 2], [0], [0]>} : vector<1x8x8xbf16>, vector<1x8x8xbf16>, vector<1x8x8xf32> -> vector<1x8x8xf32>
    "tpu.trace_stop"() : () -> ()
    %87 = vector.shape_cast %86 : vector<1x8x8xf32> to vector<8x8xf32>
    %88 = arith.truncf %87 : vector<8x8xf32> to vector<8x8xbf16>
    %c0_32 = arith.constant 0 : index
    %c8 = arith.constant 8 : index
    %89 = vector.load %arg21[%c0_32, %c8] : memref<8x32xbf16, #tpu.memory_space<vmem>>, vector<8x8xbf16>
    tpu.vector_store %arg21[%c0_32, %c8], %88 {strides = array<i32>} : memref<8x32xbf16, #tpu.memory_space<vmem>>, vector<8x8xbf16>,
    %90 = vector.extract_strided_slice %43 {offsets = [0, 0, 16], sizes = [1, 8, 8], strides = [1, 1, 1]} : vector<1x8x32xbf16> to vector<1x8x8xbf16>
    %91 = vector.extract_strided_slice %45 {offsets = [0, 0, 16], sizes = [1, 8, 8], strides = [1, 1, 1]} : vector<1x8x32xbf16> to vector<1x8x8xbf16>
    "tpu.trace_start"() <{level = 10 : i32, message = "bld,bmd->blm"}> : () -> ()
    %cst_33 = arith.constant dense<0.000000e+00> : vector<1x8x8xf32>
    %92 = tpu.matmul %90, %91, %cst_33 {dimension_numbers = #tpu.dot_dimension_numbers<[2], [2], [1], [1], [0, 0, 0, 1, 1, 1], [0], [0]>} : vector<1x8x8xbf16>, vector<1x8x8xbf16>, vector<1x8x8xf32> -> vector<1x8x8xf32>
    "tpu.trace_stop"() : () -> ()
    %93 = arith.addf %92, %49 : vector<1x8x8xf32>
    %cst_34 = arith.constant dense<0xFF800000> : vector<1x8xf32>
    %94 = vector.multi_reduction <maximumf>, %93, %cst_34 [2] : vector<1x8x8xf32> to vector<1x8xf32>
    %95 = vector.shape_cast %94 : vector<1x8xf32> to vector<1x8x1xf32>
    %96 = vector.broadcast %95 : vector<1x8x1xf32> to vector<1x8x8xf32>
    %97 = arith.subf %93, %96 : vector<1x8x8xf32>
    %98 = math.exp %97 : vector<1x8x8xf32>
    %cst_35 = arith.constant dense<0.000000e+00> : vector<1x8xf32>
    %99 = vector.multi_reduction <add>, %98, %cst_35 [2] : vector<1x8x8xf32> to vector<1x8xf32>
    %100 = vector.shape_cast %99 : vector<1x8xf32> to vector<1x8x1xf32>
    %101 = tpu.reciprocal %100 {approx = true} : vector<1x8x1xf32> -> vector<1x8x1xf32>
    %102 = vector.broadcast %101 : vector<1x8x1xf32> to vector<1x8x8xf32>
    %103 = arith.mulf %98, %102 : vector<1x8x8xf32>
    %104 = arith.truncf %103 : vector<1x8x8xf32> to vector<1x8x8xbf16>
    %105 = vector.extract_strided_slice %47 {offsets = [0, 0, 16], sizes = [1, 8, 8], strides = [1, 1, 1]} : vector<1x8x32xbf16> to vector<1x8x8xbf16>
    "tpu.trace_start"() <{level = 10 : i32, message = "blm,bmd->bld"}> : () -> ()
    %cst_36 = arith.constant dense<0.000000e+00> : vector<1x8x8xf32>
    %106 = tpu.matmul %104, %105, %cst_36 {dimension_numbers = #tpu.dot_dimension_numbers<[2], [1], [1], [2], [0, 0, 0, 1, 1, 2], [0], [0]>} : vector<1x8x8xbf16>, vector<1x8x8xbf16>, vector<1x8x8xf32> -> vector<1x8x8xf32>
    "tpu.trace_stop"() : () -> ()
    %107 = vector.shape_cast %106 : vector<1x8x8xf32> to vector<8x8xf32>
    %108 = arith.truncf %107 : vector<8x8xf32> to vector<8x8xbf16>
    %c0_37 = arith.constant 0 : index
    %c16 = arith.constant 16 : index
    %109 = vector.load %arg21[%c0_37, %c16] : memref<8x32xbf16, #tpu.memory_space<vmem>>, vector<8x8xbf16>
    tpu.vector_store %arg21[%c0_37, %c16], %108 {strides = array<i32>} : memref<8x32xbf16, #tpu.memory_space<vmem>>, vector<8x8xbf16>,
    %110 = vector.extract_strided_slice %43 {offsets = [0, 0, 24], sizes = [1, 8, 8], strides = [1, 1, 1]} : vector<1x8x32xbf16> to vector<1x8x8xbf16>
    %111 = vector.extract_strided_slice %45 {offsets = [0, 0, 24], sizes = [1, 8, 8], strides = [1, 1, 1]} : vector<1x8x32xbf16> to vector<1x8x8xbf16>
    "tpu.trace_start"() <{level = 10 : i32, message = "bld,bmd->blm"}> : () -> ()
    %cst_38 = arith.constant dense<0.000000e+00> : vector<1x8x8xf32>
    %112 = tpu.matmul %110, %111, %cst_38 {dimension_numbers = #tpu.dot_dimension_numbers<[2], [2], [1], [1], [0, 0, 0, 1, 1, 1], [0], [0]>} : vector<1x8x8xbf16>, vector<1x8x8xbf16>, vector<1x8x8xf32> -> vector<1x8x8xf32>
    "tpu.trace_stop"() : () -> ()
    %113 = arith.addf %112, %49 : vector<1x8x8xf32>
    %cst_39 = arith.constant dense<0xFF800000> : vector<1x8xf32>
    %114 = vector.multi_reduction <maximumf>, %113, %cst_39 [2] : vector<1x8x8xf32> to vector<1x8xf32>
    %115 = vector.shape_cast %114 : vector<1x8xf32> to vector<1x8x1xf32>
    %116 = vector.broadcast %115 : vector<1x8x1xf32> to vector<1x8x8xf32>
    %117 = arith.subf %113, %116 : vector<1x8x8xf32>
    %118 = math.exp %117 : vector<1x8x8xf32>
    %cst_40 = arith.constant dense<0.000000e+00> : vector<1x8xf32>
    %119 = vector.multi_reduction <add>, %118, %cst_40 [2] : vector<1x8x8xf32> to vector<1x8xf32>
    %120 = vector.shape_cast %119 : vector<1x8xf32> to vector<1x8x1xf32>
    %121 = tpu.reciprocal %120 {approx = true} : vector<1x8x1xf32> -> vector<1x8x1xf32>
    %122 = vector.broadcast %121 : vector<1x8x1xf32> to vector<1x8x8xf32>
    %123 = arith.mulf %118, %122 : vector<1x8x8xf32>
    %124 = arith.truncf %123 : vector<1x8x8xf32> to vector<1x8x8xbf16>
    %125 = vector.extract_strided_slice %47 {offsets = [0, 0, 24], sizes = [1, 8, 8], strides = [1, 1, 1]} : vector<1x8x32xbf16> to vector<1x8x8xbf16>
    "tpu.trace_start"() <{level = 10 : i32, message = "blm,bmd->bld"}> : () -> ()
    %cst_41 = arith.constant dense<0.000000e+00> : vector<1x8x8xf32>
    %126 = tpu.matmul %124, %125, %cst_41 {dimension_numbers = #tpu.dot_dimension_numbers<[2], [1], [1], [2], [0, 0, 0, 1, 1, 2], [0], [0]>} : vector<1x8x8xbf16>, vector<1x8x8xbf16>, vector<1x8x8xf32> -> vector<1x8x8xf32>
    "tpu.trace_stop"() : () -> ()
    %127 = vector.shape_cast %126 : vector<1x8x8xf32> to vector<8x8xf32>
    %128 = arith.truncf %127 : vector<8x8xf32> to vector<8x8xbf16>
    %c0_42 = arith.constant 0 : index
    %c24 = arith.constant 24 : index
    %129 = vector.load %arg21[%c0_42, %c24] : memref<8x32xbf16, #tpu.memory_space<vmem>>, vector<8x8xbf16>
    tpu.vector_store %arg21[%c0_42, %c24], %128 {strides = array<i32>} : memref<8x32xbf16, #tpu.memory_space<vmem>>, vector<8x8xbf16>,
    %c0_43 = arith.constant 0 : index
    %c0_44 = arith.constant 0 : index
    %130 = vector.load %arg21[%c0_43, %c0_44] : memref<8x32xbf16, #tpu.memory_space<vmem>>, vector<8x32xbf16>
    %c0_45 = arith.constant 0 : index
    %c0_46 = arith.constant 0 : index
    %c0_47 = arith.constant 0 : index
    %131 = vector.load %arg9[%c0_45, %c0_46, %c0_47] : memref<1x32x32xbf16, #tpu.memory_space<vmem>>, vector<1x32x32xbf16>
    %132 = vector.shape_cast %131 : vector<1x32x32xbf16> to vector<32x32xbf16>
    %cst_48 = arith.constant dense<0.000000e+00> : vector<8x32xf32>
    %133 = tpu.matmul %130, %132, %cst_48 {dimension_numbers = #tpu.dot_dimension_numbers<[1], [0], [0], [1], [0, 0, 1, 1], [], []>} : vector<8x32xbf16>, vector<32x32xbf16>, vector<8x32xf32> -> vector<8x32xf32>
    %c0_49 = arith.constant 0 : index
    %c0_50 = arith.constant 0 : index
    %c0_51 = arith.constant 0 : index
    %134 = vector.load %arg10[%c0_49, %c0_50, %c0_51] : memref<1x1x32xf32, #tpu.memory_space<vmem>>, vector<1x1x32xf32>
    %135 = vector.shape_cast %134 : vector<1x1x32xf32> to vector<1x32xf32>
    %136 = vector.broadcast %135 : vector<1x32xf32> to vector<8x32xf32>
    %137 = arith.addf %133, %136 : vector<8x32xf32>
    %138 = vector.shape_cast %137 : vector<8x32xf32> to vector<1x8x32xf32>
    %139 = arith.addf %3, %138 : vector<1x8x32xf32>
    %c0_52 = arith.constant 0 : index
    %c0_53 = arith.constant 0 : index
    %c0_54 = arith.constant 0 : index
    %140 = vector.load %arg11[%c0_52, %c0_53, %c0_54] : memref<1x1x32xf32, #tpu.memory_space<vmem>>, vector<1x1x32xf32>
    %141 = vector.shape_cast %140 : vector<1x1x32xf32> to vector<1x32xf32>
    %c0_55 = arith.constant 0 : index
    %c0_56 = arith.constant 0 : index
    %c0_57 = arith.constant 0 : index
    %142 = vector.load %arg12[%c0_55, %c0_56, %c0_57] : memref<1x1x32xf32, #tpu.memory_space<vmem>>, vector<1x1x32xf32>
    %143 = vector.shape_cast %142 : vector<1x1x32xf32> to vector<1x32xf32>
    %cst_58 = arith.constant dense<0.000000e+00> : vector<1x8xf32>
    %144 = vector.multi_reduction <add>, %139, %cst_58 [2] : vector<1x8x32xf32> to vector<1x8xf32>
    %145 = vector.shape_cast %144 : vector<1x8xf32> to vector<1x8x1xf32>
    %cst_59 = arith.constant 3.200000e+01 : f32
    %146 = vector.broadcast %cst_59 : f32 to vector<1x8x1xf32>
    %147 = arith.divf %145, %146 : vector<1x8x1xf32>
    %148 = vector.broadcast %147 : vector<1x8x1xf32> to vector<1x8x32xf32>
    %149 = arith.subf %139, %148 : vector<1x8x32xf32>
    %150 = arith.mulf %149, %149 : vector<1x8x32xf32>
    %cst_60 = arith.constant dense<0.000000e+00> : vector<1x8xf32>
    %151 = vector.multi_reduction <add>, %150, %cst_60 [2] : vector<1x8x32xf32> to vector<1x8xf32>
    %152 = vector.shape_cast %151 : vector<1x8xf32> to vector<1x8x1xf32>
    %cst_61 = arith.constant 3.200000e+01 : f32
    %153 = vector.broadcast %cst_61 : f32 to vector<1x8x1xf32>
    %154 = arith.divf %152, %153 : vector<1x8x1xf32>
    %155 = vector.broadcast %147 : vector<1x8x1xf32> to vector<1x8x32xf32>
    %156 = arith.subf %139, %155 : vector<1x8x32xf32>
    %cst_62 = arith.constant 9.99999974E-6 : f32
    %157 = vector.broadcast %cst_62 : f32 to vector<1x8x1xf32>
    %158 = arith.addf %154, %157 : vector<1x8x1xf32>
    %159 = math.rsqrt %158 : vector<1x8x1xf32>
    %160 = vector.broadcast %159 : vector<1x8x1xf32> to vector<1x8x32xf32>
    %161 = arith.mulf %156, %160 : vector<1x8x32xf32>
    %162 = vector.shape_cast %141 : vector<1x32xf32> to vector<1x1x32xf32>
    %163 = vector.broadcast %162 : vector<1x1x32xf32> to vector<1x8x32xf32>
    %164 = arith.mulf %161, %163 : vector<1x8x32xf32>
    %165 = vector.shape_cast %143 : vector<1x32xf32> to vector<1x1x32xf32>
    %166 = vector.broadcast %165 : vector<1x1x32xf32> to vector<1x8x32xf32>
    %167 = arith.addf %164, %166 : vector<1x8x32xf32>
    %168 = vector.shape_cast %167 : vector<1x8x32xf32> to vector<8x32xf32>
    %169 = arith.truncf %168 : vector<8x32xf32> to vector<8x32xbf16>
    %c0_63 = arith.constant 0 : index
    %c0_64 = arith.constant 0 : index
    %c0_65 = arith.constant 0 : index
    %170 = vector.load %arg13[%c0_63, %c0_64, %c0_65] : memref<1x32x128xbf16, #tpu.memory_space<vmem>>, vector<1x32x128xbf16>
    %171 = vector.shape_cast %170 : vector<1x32x128xbf16> to vector<32x128xbf16>
    %cst_66 = arith.constant dense<0.000000e+00> : vector<8x128xf32>
    %172 = tpu.matmul %169, %171, %cst_66 {dimension_numbers = #tpu.dot_dimension_numbers<[1], [0], [0], [1], [0, 0, 1, 1], [], []>} : vector<8x32xbf16>, vector<32x128xbf16>, vector<8x128xf32> -> vector<8x128xf32>
    %c0_67 = arith.constant 0 : index
    %c0_68 = arith.constant 0 : index
    %c0_69 = arith.constant 0 : index
    %173 = vector.load %arg14[%c0_67, %c0_68, %c0_69] : memref<1x1x128xf32, #tpu.memory_space<vmem>>, vector<1x1x128xf32>
    %174 = vector.shape_cast %173 : vector<1x1x128xf32> to vector<1x128xf32>
    %175 = vector.broadcast %174 : vector<1x128xf32> to vector<8x128xf32>
    %176 = arith.addf %172, %175 : vector<8x128xf32>
    %cst_70 = arith.constant 1.702000e+00 : f32
    %177 = vector.broadcast %cst_70 : f32 to vector<8x128xf32>
    %178 = arith.mulf %177, %176 : vector<8x128xf32>
    %179 = arith.negf %178 : vector<8x128xf32>
    %180 = math.exp %179 : vector<8x128xf32>
    %cst_71 = arith.constant 1.000000e+00 : f32
    %181 = vector.broadcast %cst_71 : f32 to vector<8x128xf32>
    %182 = arith.addf %181, %180 : vector<8x128xf32>
    %183 = arith.divf %181, %182 : vector<8x128xf32>
    %184 = arith.mulf %176, %183 : vector<8x128xf32>
    %185 = arith.truncf %184 : vector<8x128xf32> to vector<8x128xbf16>
    %c0_72 = arith.constant 0 : index
    %c0_73 = arith.constant 0 : index
    %c0_74 = arith.constant 0 : index
    %186 = vector.load %arg15[%c0_72, %c0_73, %c0_74] : memref<1x128x32xbf16, #tpu.memory_space<vmem>>, vector<1x128x32xbf16>
    %187 = vector.shape_cast %186 : vector<1x128x32xbf16> to vector<128x32xbf16>
    %cst_75 = arith.constant dense<0.000000e+00> : vector<8x32xf32>
    %188 = tpu.matmul %185, %187, %cst_75 {dimension_numbers = #tpu.dot_dimension_numbers<[1], [0], [0], [1], [0, 0, 1, 1], [], []>} : vector<8x128xbf16>, vector<128x32xbf16>, vector<8x32xf32> -> vector<8x32xf32>
    %c0_76 = arith.constant 0 : index
    %c0_77 = arith.constant 0 : index
    %c0_78 = arith.constant 0 : index
    %189 = vector.load %arg16[%c0_76, %c0_77, %c0_78] : memref<1x1x32xf32, #tpu.memory_space<vmem>>, vector<1x1x32xf32>
    %190 = vector.shape_cast %189 : vector<1x1x32xf32> to vector<1x32xf32>
    %191 = vector.broadcast %190 : vector<1x32xf32> to vector<8x32xf32>
    %192 = arith.addf %188, %191 : vector<8x32xf32>
    %193 = vector.shape_cast %192 : vector<8x32xf32> to vector<1x8x32xf32>
    %194 = arith.addf %139, %193 : vector<1x8x32xf32>
    %c0_79 = arith.constant 0 : index
    %c0_80 = arith.constant 0 : index
    %c0_81 = arith.constant 0 : index
    %195 = vector.load %arg20[%c0_79, %c0_80, %c0_81] : memref<1x8x32xf32, #tpu.memory_space<vmem>>, vector<1x8x32xf32>
    tpu.vector_store %arg20[%c0_79, %c0_80, %c0_81], %194 {strides = array<i32>} : memref<1x8x32xf32, #tpu.memory_space<vmem>>, vector<1x8x32xf32>,
    %c0_82 = arith.constant 0 : index
    %c0_83 = arith.constant 0 : index
    %196 = vector.load %arg17[%c0_82, %c0_83] : memref<1x32xf32, #tpu.memory_space<vmem>>, vector<1x32xf32>
    %c0_84 = arith.constant 0 : index
    %c0_85 = arith.constant 0 : index
    %197 = vector.load %arg18[%c0_84, %c0_85] : memref<1x32xf32, #tpu.memory_space<vmem>>, vector<1x32xf32>
    %cst_86 = arith.constant dense<0.000000e+00> : vector<1x8xf32>
    %198 = vector.multi_reduction <add>, %194, %cst_86 [2] : vector<1x8x32xf32> to vector<1x8xf32>
    %199 = vector.shape_cast %198 : vector<1x8xf32> to vector<1x8x1xf32>
    %cst_87 = arith.constant 3.200000e+01 : f32
    %200 = vector.broadcast %cst_87 : f32 to vector<1x8x1xf32>
    %201 = arith.divf %199, %200 : vector<1x8x1xf32>
    %202 = vector.broadcast %201 : vector<1x8x1xf32> to vector<1x8x32xf32>
    %203 = arith.subf %194, %202 : vector<1x8x32xf32>
    %204 = arith.mulf %203, %203 : vector<1x8x32xf32>
    %cst_88 = arith.constant dense<0.000000e+00> : vector<1x8xf32>
    %205 = vector.multi_reduction <add>, %204, %cst_88 [2] : vector<1x8x32xf32> to vector<1x8xf32>
    %206 = vector.shape_cast %205 : vector<1x8xf32> to vector<1x8x1xf32>
    %cst_89 = arith.constant 3.200000e+01 : f32
    %207 = vector.broadcast %cst_89 : f32 to vector<1x8x1xf32>
    %208 = arith.divf %206, %207 : vector<1x8x1xf32>
    %209 = vector.broadcast %201 : vector<1x8x1xf32> to vector<1x8x32xf32>
    %210 = arith.subf %194, %209 : vector<1x8x32xf32>
    %cst_90 = arith.constant 9.99999974E-6 : f32
    %211 = vector.broadcast %cst_90 : f32 to vector<1x8x1xf32>
    %212 = arith.addf %208, %211 : vector<1x8x1xf32>
    %213 = math.rsqrt %212 : vector<1x8x1xf32>
    %214 = vector.broadcast %213 : vector<1x8x1xf32> to vector<1x8x32xf32>
    %215 = arith.mulf %210, %214 : vector<1x8x32xf32>
    %216 = vector.shape_cast %196 : vector<1x32xf32> to vector<1x1x32xf32>
    %217 = vector.broadcast %216 : vector<1x1x32xf32> to vector<1x8x32xf32>
    %218 = arith.mulf %215, %217 : vector<1x8x32xf32>
    %219 = vector.shape_cast %197 : vector<1x32xf32> to vector<1x1x32xf32>
    %220 = vector.broadcast %219 : vector<1x1x32xf32> to vector<1x8x32xf32>
    %221 = arith.addf %218, %220 : vector<1x8x32xf32>
    %222 = arith.truncf %221 : vector<1x8x32xf32> to vector<1x8x32xbf16>
    %c0_91 = arith.constant 0 : index
    %c0_92 = arith.constant 0 : index
    %c0_93 = arith.constant 0 : index
    %c0_94 = arith.constant 0 : index
    %223 = vector.load %arg19[%c0_91, %c0_92, %c0_93, %c0_94] : memref<1x1x8x32xbf16, #tpu.memory_space<vmem>>, vector<1x1x8x32xbf16>
    %224 = vector.shape_cast %223 : vector<1x1x8x32xbf16> to vector<1x8x32xbf16>
    %225 = vector.shape_cast %222 : vector<1x8x32xbf16> to vector<1x1x8x32xbf16>
    tpu.vector_store %arg19[%c0_91, %c0_92, %c0_93, %c0_94], %225 {strides = array<i32>} : memref<1x1x8x32xbf16, #tpu.memory_space<vmem>>, vector<1x1x8x32xbf16>,
    return
  }
  func.func @transform_0(%arg0: i32, %arg1: i32) -> (i32, i32, i32) {
    %c0_i32 = arith.constant 0 : i32
    %c0_i32_0 = arith.constant 0 : i32
    %c0_i32_1 = arith.constant 0 : i32
    return %arg0, %c0_i32, %c0_i32_0 : i32, i32, i32
  }
  func.func @transform_1(%arg0: i32, %arg1: i32) -> (i32, i32) {
    %c0_i32 = arith.constant 0 : i32
    %c0_i32_0 = arith.constant 0 : i32
    %c0_i32_1 = arith.constant 0 : i32
    return %c0_i32, %c0_i32_0 : i32, i32
  }
  func.func @transform_2(%arg0: i32, %arg1: i32) -> (i32, i32) {
    %c0_i32 = arith.constant 0 : i32
    %c0_i32_0 = arith.constant 0 : i32
    %c0_i32_1 = arith.constant 0 : i32
    return %c0_i32, %c0_i32_0 : i32, i32
  }
  func.func @transform_3(%arg0: i32, %arg1: i32) -> (i32, i32, i32) {
    %c0_i32 = arith.constant 0 : i32
    %c0_i32_0 = arith.constant 0 : i32
    %c0_i32_1 = arith.constant 0 : i32
    return %arg1, %c0_i32, %c0_i32_0 : i32, i32, i32
  }
  func.func @transform_4(%arg0: i32, %arg1: i32) -> (i32, i32, i32) {
    %c0_i32 = arith.constant 0 : i32
    %c0_i32_0 = arith.constant 0 : i32
    %c0_i32_1 = arith.constant 0 : i32
    return %arg1, %c0_i32, %c0_i32_0 : i32, i32, i32
  }
  func.func @transform_5(%arg0: i32, %arg1: i32) -> (i32, i32, i32) {
    %c0_i32 = arith.constant 0 : i32
    %c0_i32_0 = arith.constant 0 : i32
    %c0_i32_1 = arith.constant 0 : i32
    return %arg1, %c0_i32, %c0_i32_0 : i32, i32, i32
  }
  func.func @transform_6(%arg0: i32, %arg1: i32) -> (i32, i32, i32) {
    %c0_i32 = arith.constant 0 : i32
    %c0_i32_0 = arith.constant 0 : i32
    %c0_i32_1 = arith.constant 0 : i32
    return %arg1, %c0_i32, %c0_i32_0 : i32, i32, i32
  }
  func.func @transform_7(%arg0: i32, %arg1: i32) -> (i32, i32, i32) {
    %c0_i32 = arith.constant 0 : i32
    %c0_i32_0 = arith.constant 0 : i32
    %c0_i32_1 = arith.constant 0 : i32
    return %arg1, %c0_i32, %c0_i32_0 : i32, i32, i32
  }
  func.func @transform_8(%arg0: i32, %arg1: i32) -> (i32, i32, i32) {
    %c0_i32 = arith.constant 0 : i32
    %c0_i32_0 = arith.constant 0 : i32
    %c0_i32_1 = arith.constant 0 : i32
    return %arg1, %c0_i32, %c0_i32_0 : i32, i32, i32
  }
  func.func @transform_9(%arg0: i32, %arg1: i32) -> (i32, i32, i32) {
    %c0_i32 = arith.constant 0 : i32
    %c0_i32_0 = arith.constant 0 : i32
    %c0_i32_1 = arith.constant 0 : i32
    return %arg1, %c0_i32, %c0_i32_0 : i32, i32, i32
  }
  func.func @transform_10(%arg0: i32, %arg1: i32) -> (i32, i32, i32) {
    %c0_i32 = arith.constant 0 : i32
    %c0_i32_0 = arith.constant 0 : i32
    %c0_i32_1 = arith.constant 0 : i32
    return %arg1, %c0_i32, %c0_i32_0 : i32, i32, i32
  }
  func.func @transform_11(%arg0: i32, %arg1: i32) -> (i32, i32, i32) {
    %c0_i32 = arith.constant 0 : i32
    %c0_i32_0 = arith.constant 0 : i32
    %c0_i32_1 = arith.constant 0 : i32
    return %arg1, %c0_i32, %c0_i32_0 : i32, i32, i32
  }
  func.func @transform_12(%arg0: i32, %arg1: i32) -> (i32, i32, i32) {
    %c0_i32 = arith.constant 0 : i32
    %c0_i32_0 = arith.constant 0 : i32
    %c0_i32_1 = arith.constant 0 : i32
    return %arg1, %c0_i32, %c0_i32_0 : i32, i32, i32
  }
  func.func @transform_13(%arg0: i32, %arg1: i32) -> (i32, i32, i32) {
    %c0_i32 = arith.constant 0 : i32
    %c0_i32_0 = arith.constant 0 : i32
    %c0_i32_1 = arith.constant 0 : i32
    return %arg1, %c0_i32, %c0_i32_0 : i32, i32, i32
  }
  func.func @transform_14(%arg0: i32, %arg1: i32) -> (i32, i32, i32) {
    %c0_i32 = arith.constant 0 : i32
    %c0_i32_0 = arith.constant 0 : i32
    %c0_i32_1 = arith.constant 0 : i32
    return %arg1, %c0_i32, %c0_i32_0 : i32, i32, i32
  }
  func.func @transform_15(%arg0: i32, %arg1: i32) -> (i32, i32) {
    %c0_i32 = arith.constant 0 : i32
    %c0_i32_0 = arith.constant 0 : i32
    %c0_i32_1 = arith.constant 0 : i32
    return %c0_i32, %c0_i32_0 : i32, i32
  }
  func.func @transform_16(%arg0: i32, %arg1: i32) -> (i32, i32) {
    %c0_i32 = arith.constant 0 : i32
    %c0_i32_0 = arith.constant 0 : i32
    %c0_i32_1 = arith.constant 0 : i32
    return %c0_i32, %c0_i32_0 : i32, i32
  }
  func.func @transform_17(%arg0: i32, %arg1: i32) -> (i32, i32, i32, i32) {
    %c0_i32 = arith.constant 0 : i32
    %c0_i32_0 = arith.constant 0 : i32
    %c0_i32_1 = arith.constant 0 : i32
    return %arg1, %arg0, %c0_i32, %c0_i32_0 : i32, i32, i32, i32
  }
}

</mosaic_0001>

<bundles_post_ra>
// kernel: tpu_custom_call.1
= control target key start
LH: loop header
LB: loop body
LE: loop exit
PB: predicated region body
PF: predicated region fallthrough
CT: control target
= control target key end

     0   :  { %s2756_s0 = inlined_call_operand.vmem [shape: f32[2,8,32], index: 0, kind: input, shape index: {}]   ;;  %s2757_s1 = inlined_call_operand.vmem [shape: f32[8,32], index: 1, kind: input, shape index: {}]   ;;  %s2758_s2 = inlined_call_operand.vmem [shape: f32[8,8], index: 2, kind: input, shape index: {}]   ;;  %s2759_s3 = inlined_call_operand.vmem [shape: f32[3,1,32], index: 3, kind: input, shape index: {}]   ;;  %s2760_s4 = inlined_call_operand.vmem [shape: f32[3,1,32], index: 4, kind: input, shape index: {}]   ;;  %s2761_s5 = inlined_call_operand.vmem [shape: bf16[3,32,96], index: 5, kind: input, shape index: {}]   ;;  %s2762_s6 = inlined_call_operand.vmem [shape: f32[3,1,96], index: 6, kind: input, shape index: {}]   ;;  %s2763_s7 = inlined_call_operand.vmem [shape: bf16[3,32,32], index: 7, kind: input, shape index: {}]   ;;  %s2764_s8 = inlined_call_operand.vmem [shape: f32[3,1,32], index: 8, kind: input, shape index: {}]   ;;  %s2765_s9 = inlined_call_operand.vmem [shape: f32[3,1,32], index: 9, kind: input, shape index: {}]   ;;  %s2766_s10 = inlined_call_operand.vmem [shape: f32[3,1,32], index: 10, kind: input, shape index: {}]   ;;  %s2767_s11 = inlined_call_operand.vmem [shape: bf16[3,32,128], index: 11, kind: input, shape index: {}]   ;;  %s2768_s12 = inlined_call_operand.vmem [shape: f32[3,1,128], index: 12, kind: input, shape index: {}]   ;;  %s2769_s13 = inlined_call_operand.vmem [shape: bf16[3,128,32], index: 13, kind: input, shape index: {}]   ;;  %s2770_s14 = inlined_call_operand.vmem [shape: f32[3,1,32], index: 14, kind: input, shape index: {}]   ;;  %s2771_s15 = inlined_call_operand.vmem [shape: f32[1,32], index: 15, kind: input, shape index: {}]   ;;  %s2772_s16 = inlined_call_operand.vmem [shape: f32[1,32], index: 16, kind: input, shape index: {}]   ;;  %s2773_s17 = inlined_call_operand.hbm [shape: bf16[3,2,8,32], index: 17, kind: output, shape index: {}]  }
   0x1   :  { %2790 = sst [smem:[#allocation20_spill]] %s2756_s0 }
   0x2   :  { %2791 = sst [smem:[#allocation21_spill]] %s2757_s1 }
   0x3   :  { %2792 = sst [smem:[#allocation22_spill]] %s2758_s2 }
   0x4   :  { %2793 = sst [smem:[#allocation23_spill]] %s2760_s4 }
   0x5   :  { %2794 = sst [smem:[#allocation24_spill]] %s2761_s5 }
   0x6   :  { %2795 = sst [smem:[#allocation25_spill]] %s2763_s7 }
   0x7   :  { %2796 = sst [smem:[#allocation26_spill]] %s2771_s15 }
   0x8   :  { %2797 = sst [smem:[#allocation27_spill]] %s2772_s16 }
   0x9   :  { %2798 = sst [smem:[#allocation28_spill]] %s2773_s17 }
   0xa   :  { %22 = vsyncpa [#allocation5], 0 }
   0xb   :  { %24 = vsyncpa [#allocation5 + $0x1], 0  ;;  %s2381_s24 = smov 0   ;;  %s2383_s25 = smov 0  }
   0xc   :  { %s2385_s26 = smov 0   ;;  %s2387_s27 = smov 0  }
   0xd   :  { %s2389_s28 = smov 0   ;;  %s2391_s29 = smov 0  }
   0xe   :  { %s2393_s0 = smov 0   ;;  %s2395_s30 = smov 0  }
   0xf LB: > { %2799 = sst [smem:[#allocation7_spill]] %s2244_s24  ;;  %s1858_s18 = sadd.s32 4294967295, %s2272_s30   ;;  %s2272_s30 = sphi %s2395_s30, %s30_s30   ;;  %s2268_s0 = sphi %s2393_s0, %s2844_s0   ;;  %s2264_s29 = sphi %s2391_s29, %s2843_s29   ;;  %s2260_s28 = sphi %s2389_s28, %s2842_s28   ;;  %s2256_s27 = sphi %s2387_s27, %s2841_s27   ;;  %s2252_s26 = sphi %s2385_s26, %s2840_s26   ;;  %s2248_s25 = sphi %s2383_s25, %s2839_s25   ;;  %s2244_s24 = sphi %s2381_s24, %s2838_s24  }
  0x10   : > { %2800 = sst [smem:[#allocation8_spill]] %s2248_s25  ;;  %s1859_s19 = sadd.s32 4294967294, %s2272_s30  }
  0x11   : > { %2801 = sst [smem:[#allocation9_spill]] %s2252_s26  ;;  %s39_s1 = sadd.s32 1, %s2264_s29 }
  0x12   : > { %2802 = sst [smem:[#allocation10_spill]] %s2256_s27  ;;  %p40_p0 = scmp.ge.s32.totalorder %s39_s1, 3 }
  0x13   : > { %2803 = sst [smem:[#allocation11_spill]] %s2260_s28  ;;  %s42_s20 = sadd.s32 1, %s2268_s0 }
  0x14   : > { %2804 = sst [smem:[#allocation12_spill]] %s2264_s29  ;;  %p483_p1 = scmp.ne.s32.totalorder %s2252_s26, %s2248_s25 }
  0x15   : > { %2805 = sst [smem:[#allocation13_spill]] %s2268_s0  ;;  %p484_p2 = scmp.eq.s32.totalorder %s1858_s18, 5 }
  0x16   : > { %2806 = sst [smem:[#allocation14_spill]] %s2272_s30  ;;  %s2846_s1 = smov (%p40_p0, %s39_s1), 0 }
  0x17   : > { %2807 = sst [smem:[#allocation15_spill]] %s2846_s1  ;;  %s2848_s20 = smov (!%p40_p0, %s42_s20), %s2268_s0 }
  0x18   : > { %s468_s21 = ssub.s32 %s2264_s29, %s2846_s1  ;;  %p2432_p3 = por %p484_p2, %p483_p1 }
  0x19   : > { %p44_p4 = scmp.ge.s32.totalorder %s2848_s20, 2  ;;  %p489_p5 = scmp.ne.s32.totalorder %s2248_s25, %s2244_s24 }
  0x1a   : > { %s2808_s22 = scalar_select %p2432_p3, 1, 0 }
  0x1b   : > { %p490_p6 = scmp.eq.s32.totalorder %s1859_s19, 5  ;;  %p1862_p7 = scmp.ge.s32.totalorder %s2272_s30, 1 }
  0x1c   : > { %2809 = sst [smem:[#allocation16_spill]] %s2808_s22  ;;  %s2850_s20 = smov (%p44_p4, %s2848_s20), 0 }
  0x1d   : > { %2810 = sst [smem:[#allocation17_spill]] %s2850_s20  ;;  %p2441_p8 = por %p490_p6, %p489_p5 }
  0x1e   : > { %p607_p9 = scmp.lt.s32.totalorder %s2272_s30, 7  ;;  %s469_s18 = ssub.s32 %s2268_s0, %s2850_s20 }
  0x1f   : > { %s2811_s23 = scalar_select %p2441_p8, 1, 0 }
  0x20   : > { %s473_s17 = sadd.s32 1, %s2252_s26  ;;  %s470_s16 = sor.u32 %s469_s18, %s468_s21 }
  0x21   : > { %2812 = sst [smem:[#allocation18_spill]] %s2811_s23  ;;  %p608_p10 = pnand %p1862_p7, %p607_p9 }
  0x22   : > { %p471_p11 = scmp.eq.s32.totalorder %s470_s16, 0  ;;  %s2779_s19 = sand.u32 (!%p608_p10), 1, %s2248_s25  }
  0x23   : > { %611 = sbr.rel (%p608_p10) target bundleno = 2972 (0xb9c), region = 88  ;;  %p702_p12 = scmp.lt.s32.totalorder (!%p608_p10), %s2260_s28, 1 }
  0x24   : > { %s2450_s1 = scalar_select %p471_p11, %s2252_s26, %s473_s17  }
  0x25   : > { %s2456_s29 = sshll.u32 (!%p608_p10), %s2779_s19, 2  ;;  %p706_p13 = scmp.lt.s32.totalorder (!%p608_p10), %s2256_s27, 2 }
  0x26   : > { %2813 = sst [smem:[#allocation19_spill]] %s2450_s1  ;;  %s2814_s18 = sld [smem:[#allocation20_spill]] (!%p608_p10) }
  0x27   : > { %s2816_s5 = sld [smem:[#allocation24_spill]] (!%p608_p10)  ;;  %s2817_s7 = sld [smem:[#allocation25_spill]] (!%p608_p10) }
  0x28   : > { %s701_s25 = scalar_lea.vmem (!%p608_p10), [#allocation4], %s2456_s29 }
  0x2a   : > { %s703_s20 = scalar_select %p702_p12, %s2260_s28, 1 }
  0x2b   : > { %s2461_s0 = scalar_select %p706_p13, %s2256_s27, 2 }
  0x2c   : > { %s1864_s16 = sshll.u32 %s703_s20, 3  ;;  %s2818_s28 = sld [smem:[#allocation10_spill]] }
  0x2d   : > { %s705_s19 = scalar_lea.vmem %s2814_s18, %s1864_s16  ;;  %s1918_s15 = sshll.u32 %s2461_s0, 4 }
  0x2e   : > { %s2478_s2 = scalar_lea.vmem %s2816_s5, %s1918_s15  ;;  %s2487_s18 = scalar_lea.vmem %s2817_s7, %s1918_s15 }
  0x2f   : > { %s733_s5 = scalar_lea.vmem %s2766_s10, %s2461_s0  ;;  %s2504_s20 = scalar_lea.vmem %s2767_s11, %s1918_s15 }
  0x30   : > { %s741_s17 = scalar_lea.vmem %s2768_s12, %s2461_s0  ;;  %s1921_s7 = sshll.u32 %s2461_s0, 6 }
  0x31   : > { %s749_s24 = scalar_lea.vmem %s2770_s14, %s2461_s0  ;;  %s2518_s23 = scalar_lea.vmem %s2769_s13, %s1921_s7 }
  0x32   : > { %p1873_p0 = scmp.ne.s32.totalorder %s2818_s28, 0 }
  0x33   : > { %v755_v0 = vld [vmem:[%s705_s19] sm:$0xff] (!%p1873_p0)  ;;  %s2819_s27 = sld [smem:[#allocation21_spill]] (!%p1873_p0)  ;;  %vm758_vm0 = vcmask (!%p1873_p0), 261120  }
  0x34   : > { %754 = sbr.rel (%p1873_p0) target bundleno = 61 (0x3d), region = 92 }
  0x39   : > { %v756_v1 = vld [vmem:[%s2819_s27] sm:$0xff] (!%p1873_p0) }
  0x3a   : > { %v757_v2 = vadd.f32 (!%p1873_p0), %v756_v1, %v755_v0 }
  0x3c   : > { %759 = vst.msk [vmem:[#allocation2] sm:$0xff] %vm758_vm0, %v757_v2 }
  0x3d PF: > { %vm763_vm1 = vcmask 261120   ;;  %v2138_v10 = vld [vmem:[%s2478_s2] sm:$0xff]   ;;  %v2274_v11 = vmov 0.0   ;;  %vm2275_vm2 = vmmov 0   ;;  %v2139_v12 = vld [vmem:[%s2478_s2 + $0x8] sm:$0xff]   ;;  %s2820_s2 = scalar_lea.vmem %s2759_s3, %s2461_s0  ;;  %s2821_s26 = sld [smem:[#allocation23_spill]] }
  0x3e   : > { %1959 = vmatprep.subr.bf16.mxu0 %v2274_v11  ;;  %1963 = vmatprep.mubr.msk.bf16.mxu0 %vm2275_vm2, %v2274_v11  ;;  %v1874_v17 = vld [vmem:[%s2820_s2] ss:$0 sm:$0xff]  ;;  %s2823_s28 = scalar_lea.vmem %s2762_s6, %s2461_s0  ;;  %s2276_s4 = smov 120   ;;  %vm864_vm3 = vcmask 64512   ;;  %vm928_vm4 = vcmask 1043456   ;;  %vm973_vm5 = vcmask 60416  }
  0x3f   : > { %1960 = vmatpush3.bf16.msra.mxu0 %v2138_v10  ;;  %1979 = vmatprep.subr.bf16.mxu1 %v2274_v11  ;;  %v1876_v23 = vld [vmem:[%s2823_s28] ss:$0 sm:$0xff]  ;;  %s2277_s15 = smov 96   ;;  %s2278_s27 = smov 88   ;;  %vm1092_vm6 = vcmask 126016   ;;  %vm1211_vm7 = vcmask 191616  }
  0x40   : > { %1961 = vmatprep.subr.bf16.mxu0 %v2274_v11  ;;  %1981 = vmatprep.mubr.msk.bf16.mxu1 %vm2275_vm2, %v2274_v11  ;;  %s2279_s7 = smov 80   ;;  %s2280_s19 = smov 112   ;;  %vm1330_vm8 = vcmask 257216   ;;  %vm1648_vm9 = vcmask 257024  }
  0x41   : > { %s2281_s2 = smov 72   ;;  %s2282_s21 = smov 104  }
  0x42   : > { %s2283_s22 = smov 64   ;;  %s2284_s30 = smov 56  }
  0x43   : > { %v2525_v3 = vld [vmem:[#allocation2] sm:$0xff]  ;;  %1962 = vmatpush3.bf16.msra.mxu0 %v2139_v12  ;;  %s2822_s1 = scalar_lea.vmem %s2821_s26, %s2461_s0  ;;  %s2285_s28 = smov 48  }
  0x44   : > { %v764_v4 = vsel %vm763_vm1, %v2525_v3, 0.0  ;;  %1967 = vmatprep.subr.bf16.mxu0 %v2274_v11  ;;  %v1875_v19 = vld [vmem:[%s2822_s1] ss:$0 sm:$0xff]  ;;  %s2824_s1 = sld [smem:[#allocation22_spill]]  ;;  %s2826_s26 = scalar_lea.vmem %s2765_s9, %s2461_s0 }
  0x45   : > { %765 = vadd.xlane.f32.xlu0 %v764_v4 }
  0x4a   : > { %v860_v41 = vld [vmem:[%s2824_s1] sm:$0xff] }
  0xd2   : > { %v766_v5 = vpop.xlane.xlu0 %765 }
  0xd3   : > { %v768_v6 = vmul.f32 0.03125, %v766_v5 }
  0xd5   : > { %v769_v7 = vsub.f32 %v2525_v3, %v768_v6 }
  0xd7   : > { %v770_v8 = vmul.f32 %v769_v7, %v769_v7 }
  0xd9   : > { %v771_v9 = vsel %vm763_vm1, %v770_v8, 0.0 }
  0xda   : > { %772 = vadd.xlane.f32.xlu0 %v771_v9 }
 0x167   : > { %v773_v13 = vpop.xlane.xlu0 %772 }
 0x168   : > { %v774_v14 = vmul.f32 0.03125, %v773_v13 }
 0x16a   : > { %v775_v15 = vadd.f32 1e-05, %v774_v14 }
 0x16c   : > { %2152 = vrsqrt.f32 %v775_v15 }
 0x176   : > { %v2153_v16 = vpop.eup %2152 }
 0x177   : > { %v777_v18 = vmul.f32 %v2153_v16, %v769_v7 }
 0x179   : > { %v784_v20 = vmul.f32 %v1874_v17, %v777_v18 }
 0x17b   : > { %v791_v21 = vadd.f32 %v1875_v19, %v784_v20 }
 0x17d   : > { %v792_v22 = vpack.c.bf16 %v791_v21, %v791_v21 }
 0x17f   : > { %1964 = vmatmul.mubr.msk.bf16.vlgmr.msra.gmra.mrb[0].mxu0 %vm763_vm1, %v792_v22 }
 0x180   : > { %1969 = vmatprep.mubr.msk.bf16.mxu0 %vm2275_vm2, %v2274_v11 }
 0x252   : > { %v853_v24 = vpop.f32.mrb[0].mxu0 }
 0x253   : > { %v854_v25 = vadd.f32 %v1876_v23, %v853_v24  ;;  %v1965_v26 = vpop.f32.mrb[1].mxu0 }
 0x254   : > { %v856_v27 = vpop.f32.mrb[2].mxu0 }
 0x255   : > { %v2559_v28 = vpack.c.bf16 %v854_v25, %v854_v25  ;;  %v1966_v29 = vpop.f32.mrb[3].mxu0 }
 0x257   : > { %975 = vrot.lane.b32.xlu0 %v2559_v28, %s2276_s4  ;;  %862 = vrot.lane.b32.xlu1 %v2559_v28, %s2277_s15  ;;  %s2286_s4 = smov 40   ;;  %s2287_s15 = smov 8  }
 0x25b   : > { %977 = vrot.lane.b32.xlu1 %v2559_v28, %s2278_s27  ;;  %s2288_s27 = smov 16  }
 0x25f   : > { %1096 = vrot.lane.b32.xlu1 %v2559_v28, %s2279_s7  ;;  %s2289_s7 = smov 24  }
 0x263   : > { %1094 = vrot.lane.b32.xlu1 %v2559_v28, %s2280_s19 }
 0x267   : > { %1215 = vrot.lane.b32.xlu1 %v2559_v28, %s2281_s2  ;;  %s2825_s2 = scalar_lea.vmem %s2764_s8, %s2461_s0  ;;  %s2829_s0 = sld [smem:[#allocation8_spill]] }
 0x26b   : > { %1213 = vrot.lane.b32.xlu1 %v2559_v28, %s2282_s21  ;;  %s2832_s21 = sld [smem:[#allocation27_spill]] }
 0x2c9   : > { %v863_v30 = vpop.permute.xlu1 %862  ;;  %v976_v35 = vpop.permute.xlu0 %975 }
 0x2ca   : > { %v869_v31 = vsel %vm864_vm3, %v863_v30, 0 }
 0x2cb   : > { %1968 = vmatpush3.bf16.xpose.msra.mxu0 %v869_v31 }
 0x2cc   : > { %1973 = vmatprep.subr.bf16.mxu0 %v2274_v11 }
 0x2cd   : > { %v978_v32 = vpop.permute.xlu1 %977 }
 0x2ce   : > { %v983_v33 = vsel %vm864_vm3, %v978_v32, 0 }
 0x2cf   : > { %1980 = vmatpush3.bf16.xpose.msra.mxu1 %v983_v33 }
 0x2d0   : > { %1991 = vmatprep.subr.bf16.mxu1 %v2274_v11 }
 0x2d1   : > { %v1097_v34 = vpop.permute.xlu1 %1096 }
 0x2d2   : > { %1970 = vmatmul.mubr.msk.bf16.vlgmr.msra.gmra.mrb[4].mxu0 %vm864_vm3, %v2559_v28  ;;  %v1102_v37 = vsel %vm864_vm3, %v1097_v34, 0 }
 0x2d3   : > { %1975 = vmatprep.mubr.msk.bf16.mxu0 %vm2275_vm2, %v2274_v11 }
 0x2d5   : > { %v1095_v36 = vpop.permute.xlu1 %1094 }
 0x2d6   : > { %1982 = vmatmul.mubr.msk.bf16.vlgmr.msra.gmra.mrb[0].mxu1 %vm864_vm3, %v976_v35 }
 0x2d7   : > { %1992 = vmatpush3.bf16.xpose.msra.mxu1 %v1102_v37  ;;  %1993 = vmatprep.mubr.msk.bf16.mxu1 %vm2275_vm2, %v2274_v11 }
 0x2d8   : > { %2003 = vmatprep.subr.bf16.mxu1 %v2274_v11 }
 0x2d9   : > { %v1216_v38 = vpop.permute.xlu1 %1215 }
 0x2da   : > { %v1221_v39 = vsel %vm864_vm3, %v1216_v38, 0 }
 0x2dd   : > { %v1214_v40 = vpop.permute.xlu1 %1213 }
 0x2de   : > { %1994 = vmatmul.mubr.msk.bf16.vlgmr.msra.gmra.mrb[4].mxu1 %vm864_vm3, %v1095_v36 }
 0x2df   : > { %2004 = vmatpush3.bf16.xpose.msra.mxu1 %v1221_v39  ;;  %2005 = vmatprep.mubr.msk.bf16.mxu1 %vm2275_vm2, %v2274_v11 }
 0x2e0   : > { %2015 = vmatprep.subr.bf16.mxu1 %v2274_v11 }
 0x2e6   : > { %2006 = vmatmul.mubr.msk.bf16.vlgmr.msra.gmra.mrb[8].mxu1 %vm864_vm3, %v1214_v40 }
 0x2e7   : > { %2019 = vmatprep.mubr.msk.bf16.mxu1 %vm2275_vm2, %v2274_v11 }
 0x3a5   : > { %v905_v42 = vpop.f32.mrb[4].mxu0 }
 0x3a6   : > { %v906_v43 = vadd.f32 %v905_v42, %v860_v41  ;;  %v1971_v44 = vpop.f32.mrb[5].mxu0 }
 0x3a7   : > { %v908_v45 = vpop.f32.mrb[6].mxu0 }
 0x3a8   : > { %v1972_v46 = vpop.f32.mrb[7].mxu0  ;;  %v911_v47 = vsel %vm864_vm3, %v906_v43, -inf }
 0x3a9   : > { %v1019_v48 = vpop.f32.mrb[0].mxu1  ;;  %912 = vmax.xlane.f32.xlu1 %v911_v47 }
 0x3aa   : > { %v1020_v49 = vadd.f32 %v1019_v48, %v860_v41  ;;  %v1983_v50 = vpop.f32.mrb[1].mxu1 }
 0x3ab   : > { %v1022_v51 = vpop.f32.mrb[2].mxu1 }
 0x3ac   : > { %v1984_v52 = vpop.f32.mrb[3].mxu1  ;;  %v1025_v53 = vsel %vm864_vm3, %v1020_v49, -inf }
 0x3ad   : > { %1026 = vmax.xlane.f32.xlu0 %v1025_v53 }
 0x3b1   : > { %v1138_v54 = vpop.f32.mrb[4].mxu1 }
 0x3b2   : > { %v1139_v55 = vadd.f32 %v1138_v54, %v860_v41  ;;  %v1995_v56 = vpop.f32.mrb[5].mxu1 }
 0x3b3   : > { %v1141_v57 = vpop.f32.mrb[6].mxu1 }
 0x3b4   : > { %v1996_v58 = vpop.f32.mrb[7].mxu1  ;;  %v1144_v59 = vsel %vm864_vm3, %v1139_v55, -inf }
 0x3b5   : > { %1145 = vmax.xlane.f32.xlu1 %v1144_v59  ;;  %v2140_v58 = vld [vmem:[%s2487_s18] sm:$0xff]  }
 0x3b6   : > { %2016 = vmatpush3.bf16.msra.mxu1 %v2140_v58 }
 0x3b7   : > { %2017 = vmatprep.subr.bf16.mxu1 %v2274_v11 }
 0x3b9   : > { %v1257_v60 = vpop.f32.mrb[8].mxu1 }
 0x3ba   : > { %v1258_v61 = vadd.f32 %v1257_v60, %v860_v41  ;;  %v2007_v62 = vpop.f32.mrb[9].mxu1  ;;  %v2141_v60 = vld [vmem:[%s2487_s18 + $0x8] sm:$0xff]  }
 0x3bb   : > { %v1260_v63 = vpop.f32.mrb[10].mxu1  ;;  %2018 = vmatpush3.bf16.msra.mxu1 %v2141_v60 }
 0x3bc   : > { %v2008_v0 = vpop.f32.mrb[11].mxu1  ;;  %v1263_v1 = vsel %vm864_vm3, %v1258_v61, -inf  ;;  %2031 = vmatprep.subr.bf16.mxu1 %v2274_v11 }
 0x3bd   : > { %1264 = vmax.xlane.f32.xlu0 %v1263_v1 }
 0x436   : > { %v913_v2 = vpop.xlane.xlu1 %912 }
 0x437   : > { %v914_v4 = vsub.f32 %v906_v43, %v913_v2 }
 0x439   : > { %v915_v5 = vmul.f32 1.442695, %v914_v4 }
 0x43a   : > { %v1027_v6 = vpop.xlane.xlu0 %1026 }
 0x43b   : > { %2154 = vpow2.f32 %v915_v5  ;;  %v1028_v7 = vsub.f32 %v1020_v49, %v1027_v6 }
 0x43d   : > { %v1029_v8 = vmul.f32 1.442695, %v1028_v7 }
 0x43f   : > { %2156 = vpow2.f32 %v1029_v8 }
 0x442   : > { %v1146_v19 = vpop.xlane.xlu1 %1145 }
 0x443   : > { %v1147_v20 = vsub.f32 %v1139_v55, %v1146_v19 }
 0x445   : > { %v2155_v9 = vpop.eup %2154  ;;  %v1148_v21 = vmul.f32 1.442695, %v1147_v20 }
 0x446   : > { %v917_v10 = vsel %vm864_vm3, %v2155_v9, 0.0 }
 0x447   : > { %918 = vadd.xlane.f32.xlu1 %v917_v10 }
 0x449   : > { %v2157_v12 = vpop.eup %2156 }
 0x44a   : > { %v1265_v13 = vpop.xlane.xlu0 %1264  ;;  %v1031_v14 = vsel %vm864_vm3, %v2157_v12, 0.0 }
 0x44b   : > { %v1266_v15 = vsub.f32 %v1258_v61, %v1265_v13  ;;  %1032 = vadd.xlane.f32.xlu0 %v1031_v14 }
 0x44d   : > { %v1267_v16 = vmul.f32 1.442695, %v1266_v15 }
 0x44f   : > { %2158 = vpow2.f32 %v1267_v16 }
 0x450   : > { %2160 = vpow2.f32 %v1148_v21 }
 0x458   : > { %923 = vrot.lane.b32.xlu1 %v2559_v28, %s2283_s22 }
 0x459   : > { %v2159_v17 = vpop.eup %2158 }
 0x45a   : > { %v1269_v18 = vsel %vm864_vm3, %v2159_v17, 0.0  ;;  %v2161_v22 = vpop.eup %2160 }
 0x45b   : > { %1270 = vadd.xlane.f32.xlu0 %v1269_v18  ;;  %v1150_v23 = vsel %vm864_vm3, %v2161_v22, 0.0 }
 0x471   : > { %1037 = vrot.lane.b32.xlu0 %v2559_v28, %s2284_s30 }
 0x47c   : > { %1151 = vadd.xlane.f32.xlu1 %v1150_v23 }
 0x48d   : > { %1156 = vrot.lane.b32.xlu1 %v2559_v28, %s2285_s28  ;;  %s2828_s28 = sld [smem:[#allocation11_spill]] }
 0x491   : > { %1275 = vrot.lane.b32.xlu1 %v2559_v28, %s2286_s4 }
 0x4d4   : > { %v919_v24 = vpop.xlane.xlu1 %918 }
 0x4d5   : > { %2162 = vrcp.f32 %v919_v24 }
 0x4d8   : > { %v924_v25 = vpop.permute.xlu1 %923  ;;  %v1033_v27 = vpop.xlane.xlu0 %1032 }
 0x4d9   : > { %v930_v26 = vsel %vm928_vm4, %v924_v25, 0  ;;  %2164 = vrcp.f32 %v1033_v27  ;;  %v2142_v25 = vld [vmem:[%s2504_s20] sm:$0xff]  }
 0x4da   : > { %1974 = vmatpush3.bf16.msra.mxu0 %v930_v26 }
 0x4db   : > { %1985 = vmatprep.subr.bf16.mxu0 %v2274_v11 }
 0x4df   : > { %v2163_v29 = vpop.eup %2162 }
 0x4e0   : > { %v921_v30 = vmul.f32 %v2163_v29, %v2155_v9 }
 0x4e2   : > { %v922_v31 = vpack.c.bf16 %v921_v30, %v921_v30 }
 0x4e3   : > { %v2165_v28 = vpop.eup %2164 }
 0x4e4   : > { %1976 = vmatmul.mubr.msk.bf16.vlgmr.msra.gmra.mrb[8].mxu0 %vm864_vm3, %v922_v31  ;;  %v1035_v33 = vmul.f32 %v2165_v28, %v2157_v12  ;;  %v1891_v12 = vld [vmem:[%s2825_s2] ss:$0 sm:$0xff] }
 0x4e5   : > { %1987 = vmatprep.mubr.msk.bf16.mxu0 %vm2275_vm2, %v2274_v11  ;;  %v1895_v31 = vld [vmem:[%s2826_s26] ss:$0 sm:$0xff]  ;;  %s1666_s26 = sshll.u32 %s701_s25, 4  ;;  %s2701_s26 = int_to_ptr.vmem [resolvable:$true] %s1666_s26 }
 0x4e6   : > { %v1036_v36 = vpack.c.bf16 %v1035_v33, %v1035_v33 }
 0x4e8   : > { %v1271_v32 = vpop.xlane.xlu0 %1270 }
 0x4ec   : > { %v1038_v34 = vpop.permute.xlu0 %1037 }
 0x4ed   : > { %v1043_v35 = vsel %vm928_vm4, %v1038_v34, 0 }
 0x4ee   : > { %1986 = vmatpush3.bf16.msra.mxu0 %v1043_v35 }
 0x4ef   : > { %1997 = vmatprep.subr.bf16.mxu0 %v2274_v11 }
 0x4f1   : > { %1988 = vmatmul.mubr.msk.bf16.vlgmr.msra.gmra.mrb[12].mxu0 %vm864_vm3, %v1036_v36  ;;  %v2144_v36 = vld [vmem:[%s2518_s23] sm:$0xff]  }
 0x4f2   : > { %1999 = vmatprep.mubr.msk.bf16.mxu0 %vm2275_vm2, %v2274_v11 }
 0x509   : > { %v1152_v37 = vpop.xlane.xlu1 %1151 }
 0x50a   : > { %2166 = vrcp.f32 %v1152_v37  ;;  %v2145_v37 = vld [vmem:[%s2518_s23 + $0x8] sm:$0xff]  }
 0x50b   : > { %2168 = vrcp.f32 %v1271_v32  ;;  %v1896_v32 = vld [vmem:[%s733_s5] ss:$0 sm:$0xff]  ;;  %s2833_s5 = sld [smem:[#allocation28_spill]] }
 0x50d   : > { %v1157_v38 = vpop.permute.xlu1 %1156 }
 0x50e   : > { %v1162_v39 = vsel %vm928_vm4, %v1157_v38, 0  ;;  %v2146_v38 = vld [vmem:[%s2518_s23 + $0x10] sm:$0xff]  }
 0x50f   : > { %1998 = vmatpush3.bf16.msra.mxu0 %v1162_v39  ;;  %v2147_v39 = vld [vmem:[%s2518_s23 + $0x18] sm:$0xff]  }
 0x510   : > { %2009 = vmatprep.subr.bf16.mxu0 %v2274_v11 }
 0x511   : > { %v1276_v42 = vpop.permute.xlu1 %1275 }
 0x512   : > { %v1281_v45 = vsel %vm928_vm4, %v1276_v42, 0  ;;  %v2150_v42 = vld [vmem:[%s2518_s23 + $0x30] sm:$0xff]  }
 0x514   : > { %v2167_v40 = vpop.eup %2166 }
 0x515   : > { %v1154_v41 = vmul.f32 %v2167_v40, %v2161_v22  ;;  %v2169_v44 = vpop.eup %2168  ;;  %v2148_v40 = vld [vmem:[%s2518_s23 + $0x20] sm:$0xff]  }
 0x516   : > { %v1273_v46 = vmul.f32 %v2169_v44, %v2159_v17  ;;  %v1897_v44 = vld [vmem:[%s741_s17] ss:$0 sm:$0xff]  ;;  %s2827_s17 = sld [smem:[#allocation10_spill]] }
 0x517   : > { %v1155_v43 = vpack.c.bf16 %v1154_v41, %v1154_v41  ;;  %v2149_v41 = vld [vmem:[%s2518_s23 + $0x28] sm:$0xff]  }
 0x518   : > { %v1274_v47 = vpack.c.bf16 %v1273_v46, %v1273_v46 }
 0x519   : > { %2000 = vmatmul.mubr.msk.bf16.vlgmr.msra.gmra.mrb[16].mxu0 %vm864_vm3, %v1155_v43  ;;  %v2151_v43 = vld [vmem:[%s2518_s23 + $0x38] sm:$0xff]   ;;  %s2834_s23 = sand.u32 1, %s2829_s0  }
 0x51a   : > { %2010 = vmatpush3.bf16.msra.mxu0 %v1281_v45  ;;  %2011 = vmatprep.mubr.msk.bf16.mxu0 %vm2275_vm2, %v2274_v11  ;;  %s1651_s30 = scalar_lea.sflag [#allocation5], %s2834_s23 }
 0x51b   : > { %2023 = vmatprep.subr.bf16.mxu0 %v2274_v11 }
 0x521   : > { %2012 = vmatmul.mubr.msk.bf16.vlgmr.msra.gmra.mrb[20].mxu0 %vm864_vm3, %v1274_v47 }
 0x522   : > { %2027 = vmatprep.mubr.msk.bf16.mxu0 %vm2275_vm2, %v2274_v11  ;;  %2024 = vmatpush3.bf16.msra.mxu0 %v2142_v25 }
 0x523   : > { %2025 = vmatprep.subr.bf16.mxu0 %v2274_v11 }
 0x5b7   : > { %v966_v48 = vpop.f32.mrb[8].mxu0 }
 0x5b8   : > { %v972_v49 = vpack.c.bf16 %v966_v48, %v966_v48  ;;  %v1977_v50 = vpop.f32.mrb[9].mxu0 }
 0x5b9   : > { %v969_v51 = vpop.f32.mrb[10].mxu0 }
 0x5ba   : > { %974 = vst.msk [vmem:[#allocation3] sm:$0xf] %vm973_vm5, %v972_v49  ;;  %v1978_v52 = vpop.f32.mrb[11].mxu0 }
 0x5c4   : > { %v1079_v53 = vpop.f32.mrb[12].mxu0 }
 0x5c5   : > { %v1922_v54 = vpack.c.bf16 %v1079_v53, %v1079_v53  ;;  %v1989_v55 = vpop.f32.mrb[13].mxu0 }
 0x5c6   : > { %v1082_v56 = vpop.f32.mrb[14].mxu0 }
 0x5c7   : > { %1089 = vrot.lane.b32.xlu0 %v1922_v54, %s2287_s15  ;;  %v1990_v57 = vpop.f32.mrb[15].mxu0  ;;  %v1902_v56 = vld [vmem:[%s749_s24] ss:$0 sm:$0xff]  ;;  %s1914_s24 = sshll.u32 %s2827_s17, 1  ;;  %s2178_s17 = scalar_lea.vmem %s2701_s26, 64 }
 0x5c8   : > { %s1662_s18 = sadd.s32 %s2828_s28, %s1914_s24  ;;  %p2179_p1 = scmp.ne.s32.totalorder %s2701_s26, %s2178_s17 }
 0x5c9   : > { %s1915_s16 = sshll.u32 %s1662_s18, 6  ;;  %s2290_s28 = smov [#allocation4]  }
 0x5ca   : > { %p2180_p2 = pnand %p2179_p1, %p2432_p3  ;;  %s2182_s24 = sshll.u32 %s2290_s28, 4  ;;  %s2183_s24 = int_to_ptr.vmem [resolvable:$false] %s2182_s24 }
 0x5cb   : > { %s2184_s4 = scalar_lea.vmem %s2183_s24, 128  ;;  %p2185_p5 = scmp.lt.s32.totalorder %s2701_s26, %s2183_s24 }
 0x5cc   : > { %p2181_p4 = pneg %p2180_p2  ;;  %p2186_p6 = scmp.lt.s32.totalorder %s2184_s4, %s2178_s17 }
 0x5ce   : > { %p2187_p7 = por %p2186_p6, %p2185_p5 }
 0x5d0   : > { %p2188_p9 = pnand %p2187_p7, %p2181_p4 }
 0x5ec   : > { %v1198_v59 = vpop.f32.mrb[16].mxu0 }
 0x5ed   : > { %v1923_v61 = vpack.c.bf16 %v1198_v59, %v1198_v59  ;;  %v2001_v62 = vpop.f32.mrb[17].mxu0 }
 0x5ee   : > { %v1201_v63 = vpop.f32.mrb[18].mxu0 }
 0x5ef   : > { %1208 = vrot.lane.b32.xlu1 %v1923_v61, %s2288_s27  ;;  %v2002_v0 = vpop.f32.mrb[19].mxu0  ;;  %s2830_s27 = sld [smem:[#allocation26_spill]] }
 0x5f4   : > { %v1317_v1 = vpop.f32.mrb[20].mxu0 }
 0x5f5   : > { %v1924_v2 = vpack.c.bf16 %v1317_v1, %v1317_v1  ;;  %v2013_v4 = vpop.f32.mrb[21].mxu0 }
 0x5f6   : > { %v1320_v5 = vpop.f32.mrb[22].mxu0 }
 0x5f7   : > { %1327 = vrot.lane.b32.xlu0 %v1924_v2, %s2289_s7  ;;  %v2014_v6 = vpop.f32.mrb[23].mxu0 }
 0x639   : > { %v1090_v7 = vpop.permute.xlu0 %1089 }
 0x63a   : > { %1093 = vst.msk [vmem:[#allocation3] sm:$0xf] %vm1092_vm6, %v1090_v7 }
 0x661   : > { %v1209_v8 = vpop.permute.xlu1 %1208 }
 0x662   : > { %1212 = vst.msk [vmem:[#allocation3] sm:$0xf] %vm1211_vm7, %v1209_v8 }
 0x669   : > { %v1328_v9 = vpop.permute.xlu0 %1327 }
 0x66a   : > { %1331 = vst.msk [vmem:[#allocation3] sm:$0xf] %vm1330_vm8, %v1328_v9 }
 0x671   : > { %v1332_v10 = vld [vmem:[#allocation3] sm:$0xf] }
 0x672   : > { %2020 = vmatmul.mubr.msk.bf16.vlgmr.msra.gmra.mrb[12].mxu1 %vm763_vm1, %v1332_v10  ;;  %v1911_v10 = vld [vmem:[%s2830_s27] ss:$0 sm:$0xff] }
 0x673   : > { %2047 = vmatprep.mubr.msk.bf16.mxu1 %vm2275_vm2, %v2274_v11  ;;  %2032 = vmatpush3.bf16.msra.mxu1 %v2144_v36 }
 0x674   : > { %2033 = vmatprep.subr.bf16.mxu1 %v2274_v11 }
 0x677   : > { %2034 = vmatpush3.bf16.msra.mxu1 %v2145_v37 }
 0x678   : > { %2035 = vmatprep.subr.bf16.mxu1 %v2274_v11 }
 0x67b   : > { %2036 = vmatpush3.bf16.msra.mxu1 %v2146_v38 }
 0x67c   : > { %2037 = vmatprep.subr.bf16.mxu1 %v2274_v11 }
 0x67f   : > { %2038 = vmatpush3.bf16.msra.mxu1 %v2147_v39 }
 0x680   : > { %2039 = vmatprep.subr.bf16.mxu1 %v2274_v11 }
 0x683   : > { %2040 = vmatpush3.bf16.msra.mxu1 %v2148_v40 }
 0x684   : > { %2041 = vmatprep.subr.bf16.mxu1 %v2274_v11 }
 0x687   : > { %2042 = vmatpush3.bf16.msra.mxu1 %v2149_v41 }
 0x688   : > { %2043 = vmatprep.subr.bf16.mxu1 %v2274_v11 }
 0x68b   : > { %2044 = vmatpush3.bf16.msra.mxu1 %v2150_v42 }
 0x68c   : > { %2045 = vmatprep.subr.bf16.mxu1 %v2274_v11 }
 0x68f   : > { %2046 = vmatpush3.bf16.msra.mxu1 %v2151_v43 }
 0x745   : > { %v1393_v13 = vpop.f32.mrb[12].mxu1 }
 0x746   : > { %v1394_v14 = vadd.f32 %v1891_v12, %v1393_v13  ;;  %v2021_v15 = vpop.f32.mrb[13].mxu1  ;;  %v1912_v13 = vld [vmem:[%s2832_s21] ss:$0 sm:$0xff] }
 0x747   : > { %v1396_v16 = vpop.f32.mrb[14].mxu1 }
 0x748   : > { %v2637_v17 = vadd.f32 %v1394_v14, %v2525_v3  ;;  %v2022_v18 = vpop.f32.mrb[15].mxu1  ;;  %v2143_v3 = vld [vmem:[%s2504_s20 + $0x8] sm:$0xff]   ;;  %s2699_s20 = scalar_lea.hbm %s2833_s5, %s1915_s16 }
 0x749   : > { %2026 = vmatpush3.bf16.msra.mxu0 %v2143_v3 }
 0x74a   : > { %v1402_v19 = vsel %vm763_vm1, %v2637_v17, 0.0 }
 0x74b   : > { %1403 = vadd.xlane.f32.xlu1 %v1402_v19 }
 0x7d8   : > { %v1404_v20 = vpop.xlane.xlu1 %1403 }
 0x7d9   : > { %v1405_v21 = vmul.f32 0.03125, %v1404_v20 }
 0x7db   : > { %v1406_v22 = vsub.f32 %v2637_v17, %v1405_v21 }
 0x7dd   : > { %v1407_v23 = vmul.f32 %v1406_v22, %v1406_v22 }
 0x7df   : > { %v1408_v24 = vsel %vm763_vm1, %v1407_v23, 0.0 }
 0x7e0   : > { %1409 = vadd.xlane.f32.xlu0 %v1408_v24 }
 0x86d   : > { %v1410_v26 = vpop.xlane.xlu0 %1409 }
 0x86e   : > { %v1411_v27 = vmul.f32 0.03125, %v1410_v26 }
 0x870   : > { %v1412_v29 = vadd.f32 1e-05, %v1411_v27 }
 0x872   : > { %2170 = vrsqrt.f32 %v1412_v29 }
 0x87c   : > { %v2171_v30 = vpop.eup %2170 }
 0x87d   : > { %v1414_v28 = vmul.f32 %v2171_v30, %v1406_v22 }
 0x87f   : > { %v1421_v33 = vmul.f32 %v1895_v31, %v1414_v28 }
 0x881   : > { %v1428_v34 = vadd.f32 %v1896_v32, %v1421_v33 }
 0x883   : > { %v1429_v35 = vpack.c.bf16 %v1428_v34, %v1428_v34 }
 0x885   : > { %2028 = vmatmul.mubr.msk.bf16.vlgmr.msra.gmra.mrb[24].mxu0 %vm763_vm1, %v1429_v35 }
 0x958   : > { %v1490_v45 = vpop.f32.mrb[24].mxu0 }
 0x959   : > { %v1491_v46 = vadd.f32 %v1897_v44, %v1490_v45  ;;  %v2029_v47 = vpop.f32.mrb[25].mxu0 }
 0x95a   : > { %v1493_v48 = vpop.f32.mrb[26].mxu0 }
 0x95b   : > { %v1901_v49 = vmul.f32 -1.702, %v1491_v46  ;;  %v2030_v50 = vpop.f32.mrb[27].mxu0 }
 0x95d   : > { %v1498_v51 = vmul.f32 1.442695, %v1901_v49 }
 0x95f   : > { %2172 = vpow2.f32 %v1498_v51 }
 0x969   : > { %v2173_v52 = vpop.eup %2172 }
 0x96a   : > { %v1500_v53 = vadd.f32 1.0, %v2173_v52 }
 0x96c   : > { %2174 = vrcp.f32 %v1500_v53 }
 0x976   : > { %v2175_v11 = vpop.eup %2174 }
 0x977   : > { %v1503_v54 = vmul.f32 %v2175_v11, %v1491_v46 }
 0x979   : > { %v1504_v55 = vpack.c.bf16 %v1503_v54, %v1503_v54 }
 0x97b   : > { %2048 = vmatmul.mubr.bf16.vlgmr.msra.gmra.mrb[16].mxu1 %v1504_v55 }
 0xa4e   : > { %v1610_v57 = vpop.f32.mrb[16].mxu1 }
 0xa4f   : > { %v1611_v58 = vadd.f32 %v1902_v56, %v1610_v57  ;;  %v2049_v59 = vpop.f32.mrb[17].mxu1 }
 0xa50   : > { %v1613_v60 = vpop.f32.mrb[18].mxu1 }
 0xa51   : > { %v1616_v61 = vadd.f32 %v1611_v58, %v2637_v17  ;;  %v2050_v62 = vpop.f32.mrb[19].mxu1 }
 0xa53   : > { %1617 = vst.msk [vmem:[#allocation2] sm:$0xff] %vm763_vm1, %v1616_v61  ;;  %v1620_v63 = vsel %vm763_vm1, %v1616_v61, 0.0 }
 0xa54   : > { %1621 = vadd.xlane.f32.xlu0 %v1620_v63 }
 0xae1   : > { %v1622_v0 = vpop.xlane.xlu0 %1621 }
 0xae2   : > { %v1623_v1 = vmul.f32 0.03125, %v1622_v0 }
 0xae4   : > { %v1624_v2 = vsub.f32 %v1616_v61, %v1623_v1 }
 0xae6   : > { %v1625_v4 = vmul.f32 %v1624_v2, %v1624_v2 }
 0xae8   : > { %v1626_v5 = vsel %vm763_vm1, %v1625_v4, 0.0 }
 0xae9   : > { %1627 = vadd.xlane.f32.xlu1 %v1626_v5 }
 0xb76   : > { %v1628_v6 = vpop.xlane.xlu1 %1627 }
 0xb77   : > { %v1629_v7 = vmul.f32 0.03125, %v1628_v6 }
 0xb79   : > { %v1630_v8 = vadd.f32 1e-05, %v1629_v7 }
 0xb7b   : > { %2176 = vrsqrt.f32 %v1630_v8 }
 0xb85   : > { %v2177_v9 = vpop.eup %2176 }
 0xb86   : > { %v1632_v12 = vmul.f32 %v2177_v9, %v1624_v2 }
 0xb88   : > { %v1639_v14 = vmul.f32 %v1911_v10, %v1632_v12 }
 0xb8a   : > { %v1646_v15 = vadd.f32 %v1912_v13, %v1639_v14 }
 0xb8c   : > { %v1647_v16 = vpack.c.bf16 %v1646_v15, %v1646_v15 }
 0xb8e   : > { %1649 = vst.msk [vmem:[%s701_s25] sm:$0xf] %vm1648_vm9, %v1647_v16 }
 0xb8f   : > { %2191 = shalt.err (!%p2188_p9)
}
 0xb90   : > { %s2192_s29 = scalar_lea.hbm %s2699_s20, 64  ;;  %s2196_s15 = scalar_lea.hbm %s2833_s5, 384 }
 0xb91   : > { %p2193_p10 = scmp.ne.s32.totalorder %s2699_s20, %s2192_s29  ;;  %p2197_p13 = scmp.lt.u32.totalorder %s2699_s20, %s2833_s5 }
 0xb92   : > { %p2198_p0 = scmp.lt.u32.totalorder %s2196_s15, %s2192_s29  ;;  %p2200_p2 = scmp.lt.u32.totalorder %s2192_s29, %s2699_s20 }
 0xb93   : > { %p2194_p11 = pnand %p2193_p10, %p2432_p3 }
 0xb94   : > { %p2199_p1 = por %p2198_p0, %p2197_p13 }
 0xb95   : > { %p2195_p12 = pneg %p2194_p11 }
 0xb96   : > { %p2201_p4 = por %p2200_p2, %p2199_p1 }
 0xb98   : > { %p2202_p5 = pnand %p2201_p4, %p2195_p12 }
 0xb9a   : > { %2205 = shalt.err (!%p2202_p5)
}
 0xb9b   : > { %2051 = dma.vmem_to_hbm [thread:$0]  (%p2432_p3), %s2701_s26, 64, %s2699_s20, %s1651_s30  }
 0xb9c PF: > { %s2835_s19 = sld [smem:[#allocation14_spill]]  ;;  %s2836_s2 = sld [smem:[#allocation7_spill]] }
 0xba2   : > { %p2057_p6 = scmp.ge.s32.totalorder %s2835_s19, 2  ;;  %s1678_s16 = sand.u32 1, %s2836_s2  }
 0xba3   : > { %s1679_s1 = scalar_lea.sflag [#allocation5], %s1678_s16 }
 0xba4   : > { %p2054_p7 = pnand %p2057_p6, %p2441_p8 }
 0xba6   : > { %2239 = dma.done.wait (!%p2054_p7), %s1679_s1, 64  }
 0xba7   : > { %2241 = vsyncadd (!%p2054_p7), %s1679_s1, 4294967232  ;;  %s30_s30 = sadd.s32 1, %s2835_s19   ;;  %s2838_s24 = sld [smem:[#allocation8_spill]] }
 0xba8   : > { %p27_p9 = scmp.ge.s32.totalorder %s30_s30, 8   ;;  %s2839_s25 = sld [smem:[#allocation9_spill]] }
 0xba9   : > { %s2840_s26 = sld [smem:[#allocation19_spill]]  ;;  %s2841_s27 = sld [smem:[#allocation12_spill]] }
 0xbaa   : > { %s2842_s28 = sld [smem:[#allocation13_spill]]  ;;  %s2843_s29 = sld [smem:[#allocation15_spill]] }
 0xbab   : > { %s2844_s0 = sld [smem:[#allocation17_spill]]  ;;  %29 = sbr.rel (!%p27_p9) target bundleno = 15 (0xf), region = 163 }
 0xbb2   :  { %1684 = vsyncpa [#allocation5], 1 }
 0xbb3   :  { %1686 = vsyncpa [#allocation5 + $0x1], 1 }

</bundles_post_ra>
